<compile_context>
chip_gen: v6e
topology: v6e:2x2x1
jax: 0.10.0
libtpu: 0.0.40
codegen_flags: <defaults>
</compile_context>

<pallas_src>
import math
from functools import partial

import jax
import jax.numpy as jnp
from jax import lax
from jax.experimental import pallas as pl
from jax.experimental.pallas import tpu as pltpu


def _head_kernel(x_ref, e0_ref, s1_ref, w_ref, b_ref, o_ref, *, eps,
                 exact_round_trip):
    # x_ref:  (1, TL, C)   sequence tile of one batch element (native dtype)
    # e0_ref: (1, 1, C)    f32  modulation[0] + e      (shift)
    # s1_ref: (1, 1, C)    f32  1 + modulation[1] + e  (scale)
    # w_ref:  (C, OP)      head weight, zero-padded to OP lanes (resident)
    # b_ref:  (1, OP)      f32 head bias, zero-padded
    # o_ref:  (1, TL, OP)  output tile (lane-dense)
    x = x_ref[0].astype(jnp.float32)                       # (TL, C)

    # WanLayerNorm: fp32 LayerNorm over C, no affine, eps inside rsqrt.
    # One-pass statistics: var = E[x^2] - mean^2 (clamped at 0).
    mean = jnp.mean(x, axis=-1, keepdims=True)
    m2 = jnp.mean(x * x, axis=-1, keepdims=True)
    var = jnp.maximum(m2 - mean * mean, 0.0)
    xn = (x - mean) * lax.rsqrt(var + eps)                 # (TL, C) f32

    # PyTorch does norm(x).type_as(x) before modulating; only costs anything
    # (and only changes bits) when x is narrower than f32.
    if exact_round_trip and x_ref.dtype != jnp.float32:
        xn = xn.astype(x_ref.dtype).astype(jnp.float32)

    # modulate: norm(x) * (1 + e1) + e0  (broadcast over rows), in f32.
    y = xn * s1_ref[0] + e0_ref[0]                         # (TL, C) f32

    # Head projection on the MXU with lane-dense N; accumulate in f32.
    out = jnp.dot(y.astype(w_ref.dtype), w_ref[...],
                  preferred_element_type=jnp.float32)
    out = out + b_ref[...]
    o_ref[0] = out.astype(o_ref.dtype)


def _vmem_capacity_bytes():
    """Physical VMEM per TensorCore; conservative fallback if query fails."""
    try:
        return int(pltpu.get_tpu_info().vmem_capacity_bytes)
    except Exception:
        return 64 << 20            # v7x-sized fallback: safe on every generation


def _pick_tile_and_vmem(L, C, OP, x_isz, w_isz, tile_l=None):
    """Pick the largest L tile whose full footprint (double-buffered streams,
    resident weight, in-kernel f32 temporaries) fits in ~80% of VMEM."""
    cap = _vmem_capacity_bytes()
    budget = int(cap * 0.80)                     # headroom for Mosaic scratch
    # Tile-independent residents (weight / bias / e0 / s1 are double-buffered
    # by the auto-pipeliner even though their block indices never change).
    fixed = 2 * (C * OP * w_isz + OP * 4 + 2 * C * 4)
    # Per-sequence-row cost: double-buffered x and out tiles in native dtype,
    # plus the f32 temporaries (x upcast / normalized / modulated) and the
    # f32 matmul result tile.
    per_row = 2 * C * x_isz + 2 * OP * x_isz + 3 * C * 4 + OP * 4
    avail = budget - fixed - (2 << 20)
    cap_rows = max(8, avail // per_row)
    if tile_l is not None:
        tl = max(1, min(tile_l, L))
    else:
        tl = min(L, 1024, cap_rows)
        if tl < L:
            tl = max(8, (tl // 8) * 8)           # sublane alignment when tiled
    need = fixed + per_row * tl + (4 << 20)      # slack for pipeline internals
    vmem_limit = int(min(max(need, 32 << 20), int(cap * 0.85)))
    return tl, vmem_limit


def head_forward(x, e, modulation, weight, bias, *, eps=1e-6, tile_l=None,
                 exact_round_trip=True):
    """x: [B, L, C], e: [B, C] (f32), modulation: [2, C],
    weight: [C, O] (pre-transposed vs torch), bias: [O] -> out: [B, L, O]."""
    B, L, C = x.shape
    O = weight.shape[1]
    OP = max(128, ((O + 127) // 128) * 128)      # lane-dense output width

    # Tiny per-batch modulation vectors, computed once (B x C), f32.
    e32 = e.astype(jnp.float32)
    mod32 = modulation.astype(jnp.float32)
    e0 = (mod32[0:1, :] + e32).reshape(B, 1, C)            # shift
    s1 = (1.0 + mod32[1:2, :] + e32).reshape(B, 1, C)      # scale

    # Zero-pad the skinny output dimension up to 128 lanes; sliced off below.
    w_pad = weight if OP == O else jnp.pad(weight, ((0, 0), (0, OP - O)))
    b_pad = bias.astype(jnp.float32)
    if OP != O:
        b_pad = jnp.pad(b_pad, ((0, OP - O),))
    b_pad = b_pad.reshape(1, OP)

    x_isz = jnp.dtype(x.dtype).itemsize
    w_isz = jnp.dtype(weight.dtype).itemsize
    tl, vmem_limit = _pick_tile_and_vmem(L, C, OP, x_isz, w_isz, tile_l)
    grid = (pl.cdiv(L, tl), B)    # long axis first: both v7x TCs busy at B=1

    kernel = partial(_head_kernel, eps=eps, exact_round_trip=exact_round_trip)
    out = pl.pallas_call(
        kernel,
        out_shape=jax.ShapeDtypeStruct((B, L, OP), x.dtype),
        grid_spec=pltpu.PrefetchScalarGridSpec(
            num_scalar_prefetch=0,
            grid=grid,
            in_specs=[
                pl.BlockSpec((1, tl, C), lambda l, b: (b, l, 0)),   # x (streamed)
                pl.BlockSpec((1, 1, C), lambda l, b: (b, 0, 0)),    # e0 (shift)
                pl.BlockSpec((1, 1, C), lambda l, b: (b, 0, 0)),    # s1 (scale)
                pl.BlockSpec((C, OP), lambda l, b: (0, 0)),         # weight
                pl.BlockSpec((1, OP), lambda l, b: (0, 0)),         # bias
            ],
            out_specs=pl.BlockSpec((1, tl, OP), lambda l, b: (b, l, 0)),
        ),
        compiler_params=pltpu.CompilerParams(
            dimension_semantics=("parallel", "parallel"),
            vmem_limit_bytes=vmem_limit),
    )(x, e0, s1, w_pad, b_pad)
    # TODO(synk): once the target JAX build is confirmed to lower
    # BlockSpec(pipeline_mode=pl.Buffered(...)) inside pallas_call, single-buffer
    # the invariant weight/e0/s1/bias operands and sweep Buffered(3) on x for v7x.
    if OP != O:
        out = out[..., :O]
    return out


def head_reference(x, e, modulation, weight, bias, *, eps=1e-6):
    """Pure-JAX reference mirroring the PyTorch module."""
    xf = x.astype(jnp.float32)
    mean = jnp.mean(xf, axis=-1, keepdims=True)
    var = jnp.mean((xf - mean) ** 2, axis=-1, keepdims=True)
    xn = ((xf - mean) / jnp.sqrt(var + eps)).astype(x.dtype).astype(jnp.float32)
    em = modulation.astype(jnp.float32)[None, :, :] + e.astype(jnp.float32)[:, None, :]
    e0 = em[:, 0:1, :]
    e1 = em[:, 1:2, :]
    y = xn * (1.0 + e1) + e0
    out = y.astype(weight.dtype) @ weight + bias
    return out.astype(x.dtype)


if __name__ == "__main__":
    # Small, module-consistent shapes.
    dim = 128                  # C (model dim)
    out_dim = 4
    patch_size = (1, 2, 2)     # prod = 4 -> O = 16 (padded to 128 lanes in-kernel)
    O = math.prod(patch_size) * out_dim
    B, L = 2, 256
    eps = 1e-6

    key = jax.random.PRNGKey(0)
    k_x, k_e, k_mod, k_w, k_b = jax.random.split(key, 5)

    x = jax.random.normal(k_x, (B, L, dim), dtype=jnp.float32)
    e = jax.random.normal(k_e, (B, dim), dtype=jnp.float32)

    # Parameters (matching __init__ shapes):
    # modulation: (1, 2, dim) / sqrt(dim) -> stored flattened as (2, dim)
    modulation = jax.random.normal(k_mod, (2, dim), dtype=jnp.float32) / math.sqrt(dim)
    # nn.Linear(dim, O): uniform(-1/sqrt(dim), 1/sqrt(dim)); stored as [dim, O]
    bound = 1.0 / math.sqrt(dim)
    weight = jax.random.uniform(k_w, (dim, O), dtype=jnp.float32,
                                minval=-bound, maxval=bound)
    bias = jax.random.uniform(k_b, (O,), dtype=jnp.float32,
                              minval=-bound, maxval=bound)

    ref = head_reference(x, e, modulation, weight, bias, eps=eps)

    # 1) default tiling (single L tile at this small L), lane-padded output path
    out = jax.block_until_ready(head_forward(x, e, modulation, weight, bias, eps=eps))
    assert out.shape == (B, L, O), out.shape
    assert jnp.allclose(out, ref, atol=1e-4, rtol=1e-4), \
        float(jnp.max(jnp.abs(out - ref)))

    # 2) force multiple L tiles to exercise the (L//TL, B) grid path
    out2 = jax.block_until_ready(
        head_forward(x, e, modulation, weight, bias, eps=eps, tile_l=64))
    assert jnp.allclose(out2, ref, atol=1e-4, rtol=1e-4), \
        float(jnp.max(jnp.abs(out2 - ref)))

    # 3) bf16 activations exercise the .type_as(x) round-trip branch
    xb = x.astype(jnp.bfloat16)
    refb = head_reference(xb, e, modulation, weight, bias, eps=eps)
    outb = jax.block_until_ready(head_forward(xb, e, modulation, weight, bias, eps=eps))
    assert jnp.allclose(outb.astype(jnp.float32), refb.astype(jnp.float32),
                        atol=5e-2, rtol=5e-2), \
        float(jnp.max(jnp.abs(outb.astype(jnp.float32) - refb.astype(jnp.float32))))

    print("KERNEL_OK")
</pallas_src>

<mosaic_0001>
module attributes {stable_mosaic.version = 11 : i64} {
  func.func @_head_kernel(%arg0: i32, %arg1: i32, %arg2: memref<1x256x128xf32, #tpu.memory_space<vmem>>, %arg3: memref<1x1x128xf32, #tpu.memory_space<vmem>>, %arg4: memref<1x1x128xf32, #tpu.memory_space<vmem>>, %arg5: memref<128x128xf32, #tpu.memory_space<vmem>>, %arg6: memref<1x128xf32, #tpu.memory_space<vmem>>, %arg7: memref<1x256x128xf32, #tpu.memory_space<vmem>>) attributes {dimension_semantics = [#tpu.dimension_semantics<parallel>, #tpu.dimension_semantics<parallel>], iteration_bounds = array<i64: 1, 2>, scalar_prefetch = 0 : i64, scratch_operands = 0 : i64, tpu.core_type = #tpu.core_type<tc>, window_params = [{transform_indices = @transform_0, window_bounds = array<i64: 1, 256, 128>}, {transform_indices = @transform_1, window_bounds = array<i64: 1, 1, 128>}, {transform_indices = @transform_2, window_bounds = array<i64: 1, 1, 128>}, {pipeline_mode = #tpu.pipeline_mode<synchronous>, transform_indices = @transform_3, window_bounds = array<i64: 128, 128>}, {pipeline_mode = #tpu.pipeline_mode<synchronous>, transform_indices = @transform_4, window_bounds = array<i64: 1, 128>}, {transform_indices = @transform_5, window_bounds = array<i64: 1, 256, 128>}]} {
    %c0 = arith.constant 0 : index
    %c0_0 = arith.constant 0 : index
    %c0_1 = arith.constant 0 : index
    %0 = vector.load %arg2[%c0, %c0_0, %c0_1] : memref<1x256x128xf32, #tpu.memory_space<vmem>>, vector<1x256x128xf32>
    %1 = vector.shape_cast %0 : vector<1x256x128xf32> to vector<256x128xf32>
    %cst = arith.constant dense<0.000000e+00> : vector<256xf32>
    %2 = vector.multi_reduction <add>, %1, %cst [1] : vector<256x128xf32> to vector<256xf32>
    %3 = vector.shape_cast %2 : vector<256xf32> to vector<256x1xf32>
    %cst_2 = arith.constant 1.280000e+02 : f32
    %4 = vector.broadcast %cst_2 : f32 to vector<256x1xf32>
    %5 = arith.divf %3, %4 : vector<256x1xf32>
    %6 = arith.mulf %1, %1 : vector<256x128xf32>
    %cst_3 = arith.constant dense<0.000000e+00> : vector<256xf32>
    %7 = vector.multi_reduction <add>, %6, %cst_3 [1] : vector<256x128xf32> to vector<256xf32>
    %8 = vector.shape_cast %7 : vector<256xf32> to vector<256x1xf32>
    %cst_4 = arith.constant 1.280000e+02 : f32
    %9 = vector.broadcast %cst_4 : f32 to vector<256x1xf32>
    %10 = arith.divf %8, %9 : vector<256x1xf32>
    %11 = arith.mulf %5, %5 : vector<256x1xf32>
    %12 = arith.subf %10, %11 : vector<256x1xf32>
    %cst_5 = arith.constant 0.000000e+00 : f32
    %13 = vector.broadcast %cst_5 : f32 to vector<256x1xf32>
    %14 = arith.maximumf %12, %13 : vector<256x1xf32>
    %15 = vector.broadcast %5 : vector<256x1xf32> to vector<256x128xf32>
    %16 = arith.subf %1, %15 : vector<256x128xf32>
    %cst_6 = arith.constant 9.99999997E-7 : f32
    %17 = vector.broadcast %cst_6 : f32 to vector<256x1xf32>
    %18 = arith.addf %14, %17 : vector<256x1xf32>
    %19 = math.rsqrt %18 : vector<256x1xf32>
    %20 = vector.broadcast %19 : vector<256x1xf32> to vector<256x128xf32>
    %21 = arith.mulf %16, %20 : vector<256x128xf32>
    %c0_7 = arith.constant 0 : index
    %c0_8 = arith.constant 0 : index
    %c0_9 = arith.constant 0 : index
    %22 = vector.load %arg4[%c0_7, %c0_8, %c0_9] : memref<1x1x128xf32, #tpu.memory_space<vmem>>, vector<1x1x128xf32>
    %23 = vector.shape_cast %22 : vector<1x1x128xf32> to vector<1x128xf32>
    %24 = vector.broadcast %23 : vector<1x128xf32> to vector<256x128xf32>
    %25 = arith.mulf %21, %24 : vector<256x128xf32>
    %c0_10 = arith.constant 0 : index
    %c0_11 = arith.constant 0 : index
    %c0_12 = arith.constant 0 : index
    %26 = vector.load %arg3[%c0_10, %c0_11, %c0_12] : memref<1x1x128xf32, #tpu.memory_space<vmem>>, vector<1x1x128xf32>
    %27 = vector.shape_cast %26 : vector<1x1x128xf32> to vector<1x128xf32>
    %28 = vector.broadcast %27 : vector<1x128xf32> to vector<256x128xf32>
    %29 = arith.addf %25, %28 : vector<256x128xf32>
    %c0_13 = arith.constant 0 : index
    %c0_14 = arith.constant 0 : index
    %30 = vector.load %arg5[%c0_13, %c0_14] : memref<128x128xf32, #tpu.memory_space<vmem>>, vector<128x128xf32>
    %cst_15 = arith.constant dense<0.000000e+00> : vector<256x128xf32>
    %31 = tpu.matmul %29, %30, %cst_15 {dimension_numbers = #tpu.dot_dimension_numbers<[1], [0], [0], [1], [0, 0, 1, 1], [], []>} : vector<256x128xf32>, vector<128x128xf32>, vector<256x128xf32> -> vector<256x128xf32>
    %c0_16 = arith.constant 0 : index
    %c0_17 = arith.constant 0 : index
    %32 = vector.load %arg6[%c0_16, %c0_17] : memref<1x128xf32, #tpu.memory_space<vmem>>, vector<1x128xf32>
    %33 = vector.broadcast %32 : vector<1x128xf32> to vector<256x128xf32>
    %34 = arith.addf %31, %33 : vector<256x128xf32>
    %c0_18 = arith.constant 0 : index
    %c0_19 = arith.constant 0 : index
    %c0_20 = arith.constant 0 : index
    %35 = vector.load %arg7[%c0_18, %c0_19, %c0_20] : memref<1x256x128xf32, #tpu.memory_space<vmem>>, vector<1x256x128xf32>
    %36 = vector.shape_cast %35 : vector<1x256x128xf32> to vector<256x128xf32>
    %37 = vector.shape_cast %34 : vector<256x128xf32> to vector<1x256x128xf32>
    tpu.vector_store %arg7[%c0_18, %c0_19, %c0_20], %37 {strides = array<i32>} : memref<1x256x128xf32, #tpu.memory_space<vmem>>, vector<1x256x128xf32>,
    return
  }
  func.func @transform_0(%arg0: i32, %arg1: i32) -> (i32, i32, i32) {
    %c0_i32 = arith.constant 0 : i32
    %c0_i32_0 = arith.constant 0 : i32
    return %arg1, %arg0, %c0_i32 : i32, i32, i32
  }
  func.func @transform_1(%arg0: i32, %arg1: i32) -> (i32, i32, i32) {
    %c0_i32 = arith.constant 0 : i32
    %c0_i32_0 = arith.constant 0 : i32
    %c0_i32_1 = arith.constant 0 : i32
    return %arg1, %c0_i32, %c0_i32_0 : i32, i32, i32
  }
  func.func @transform_2(%arg0: i32, %arg1: i32) -> (i32, i32, i32) {
    %c0_i32 = arith.constant 0 : i32
    %c0_i32_0 = arith.constant 0 : i32
    %c0_i32_1 = arith.constant 0 : i32
    return %arg1, %c0_i32, %c0_i32_0 : i32, i32, i32
  }
  func.func @transform_3(%arg0: i32, %arg1: i32) -> (i32, i32) {
    %c0_i32 = arith.constant 0 : i32
    %c0_i32_0 = arith.constant 0 : i32
    %c0_i32_1 = arith.constant 0 : i32
    return %c0_i32, %c0_i32_0 : i32, i32
  }
  func.func @transform_4(%arg0: i32, %arg1: i32) -> (i32, i32) {
    %c0_i32 = arith.constant 0 : i32
    %c0_i32_0 = arith.constant 0 : i32
    %c0_i32_1 = arith.constant 0 : i32
    return %c0_i32, %c0_i32_0 : i32, i32
  }
  func.func @transform_5(%arg0: i32, %arg1: i32) -> (i32, i32, i32) {
    %c0_i32 = arith.constant 0 : i32
    %c0_i32_0 = arith.constant 0 : i32
    return %arg1, %arg0, %c0_i32 : i32, i32, i32
  }
}

</mosaic_0001>

<bundles_post_ra>
// kernel: tpu_custom_call.1
= control target key start
LH: loop header
LB: loop body
LE: loop exit
PB: predicated region body
PF: predicated region fallthrough
CT: control target
= control target key end

     0   :  { %s2588_s0 = inlined_call_operand.hbm [shape: f32[2,256,128], index: 0, kind: input, shape index: {}]   ;;  %s2589_s1 = inlined_call_operand.hbm [shape: f32[2,1,128], index: 1, kind: input, shape index: {}]   ;;  %s2590_s2 = inlined_call_operand.vmem [shape: f32[2,1,128], index: 2, kind: input, shape index: {}]   ;;  %s2591_s3 = inlined_call_operand.hbm [shape: f32[128,128], index: 3, kind: input, shape index: {}]   ;;  %s2592_s4 = inlined_call_operand.vmem [shape: f32[1,128], index: 4, kind: input, shape index: {}]   ;;  %s2593_s5 = inlined_call_operand.hbm [shape: f32[2,256,128], index: 5, kind: output, shape index: {}]  }
   0x1   :  { %2601 = sst [smem:[#allocation18_spill]] %s2588_s0 }
   0x2   :  { %2602 = sst [smem:[#allocation19_spill]] %s2591_s3 }
   0x3   :  { %10 = vsyncpa [#allocation3], 0 }
   0x4   :  { %12 = vsyncpa [#allocation3 + $0x1], 0 }
   0x5   :  { %13 = vsyncpa [#allocation6], 0 }
   0x6   :  { %15 = vsyncpa [#allocation6 + $0x1], 0 }
   0x7   :  { %16 = vsyncpa [#allocation4], 0 }
   0x8   :  { %18 = vsyncpa [#allocation4 + $0x1], 0  ;;  %s1844_s18 = smov 0   ;;  %s1846_s19 = smov 0  }
   0x9   :  { %s1848_s20 = smov 0   ;;  %s1850_s21 = smov 0  }
   0xa   :  { %s1852_s22 = smov 0   ;;  %s1854_s23 = smov 0  }
   0xb LB: > { %2603 = sst [smem:[#allocation13_spill]] %s1792_s20  ;;  %s1875_s24 = sadd.s32 4294967295, %s1804_s23   ;;  %s1804_s23 = sphi %s1854_s23, %s24_s23   ;;  %s1800_s22 = sphi %s1852_s22, %s2629_s22   ;;  %s1796_s21 = sphi %s1850_s21, %s2628_s21   ;;  %s1792_s20 = sphi %s1848_s20, %s2624_s20   ;;  %s1788_s19 = sphi %s1846_s19, %s2627_s19   ;;  %s1784_s18 = sphi %s1844_s18, %s2626_s18  }
   0xc   : > { %2604 = sst [smem:[#allocation14_spill]] %s1804_s23  ;;  %s1306_s25 = sadd.s32 4294967294, %s1804_s23  }
   0xd   : > { %p58_p0 = scmp.ne.s32.totalorder %s1788_s19, %s1784_s18  ;;  %p59_p1 = scmp.eq.s32.totalorder %s1875_s24, 0 }
   0xe   : > { %p184_p3 = scmp.eq.s32.totalorder %s1306_s25, 1  ;;  %p1307_p5 = scmp.ge.s32.totalorder %s1804_s23, 1 }
   0xf   : > { %p1884_p4 = por %p59_p1, %p58_p0  ;;  %p191_p7 = scmp.lt.s32.totalorder %s1804_s23, 3 }
  0x10   : > { %p1889_p6 = por %p184_p3, %p58_p0  ;;  %s1806_s29 = smov [#allocation7]  }
  0x11   : > { %p1894_p8 = pnand %p1307_p5, %p191_p7  ;;  %s203_s30 = sshll.u32 %s1806_s29, 4  ;;  %s204_s30 = int_to_ptr.vmem [resolvable:$true] %s203_s30 }
  0x12   : > { %s2606_s27 = scalar_select %p1889_p6, 1, 0 }
  0x13   : > { %p1498_p9 = pneg %p1894_p8  ;;  %p1309_p10 = scmp.ge.s32.totalorder %s1804_s23, 2 }
  0x14   : > { %2607 = sst [smem:[#allocation15_spill]] %s2606_s27  ;;  %s33_s7 = sadd.s32 1, %s1800_s22 }
  0x15   : > { %p1903_p11 = pnand %p1498_p9, %p59_p1  ;;  %s1645_s8 = scalar_lea.vmem %s204_s30, 2048 }
  0x16   : > { %p1646_p13 = scmp.ne.s32.totalorder %s204_s30, %s1645_s8  ;;  %p1653_p5 = scmp.lt.s32.totalorder %s204_s30, %s204_s30 }
  0x17   : > { %p1636_p12 = pneg %p1903_p11  ;;  %p1654_p7 = scmp.lt.s32.totalorder %s1645_s8, %s1645_s8 }
  0x19   : > { %p1648_p0 = pnand %p1646_p13, %p1636_p12  ;;  %p1655_p2 = por %p1654_p7, %p1653_p5 }
  0x1b   : > { %p1649_p3 = pneg %p1648_p0 }
  0x1d   : > { %p1656_p6 = pnand %p1655_p2, %p1649_p3 }
  0x1f   : > { %1659 = shalt.err (!%p1656_p6)
}
  0x20   : > { %s2594_s9 = smov 128   ;;  %s2595_s10 = smov 8  }
  0x21   : > { %s2610_s3 = sld [smem:[#allocation19_spill]]  ;;  %p34_p2 = scmp.ge.s32.totalorder %s33_s7, 2 }
  0x22   : > { %s45_s13 = sadd.s32 1, %s1792_s20  ;;  %p52_p6 = scmp.ne.s32.totalorder %s1792_s20, %s1788_s19 }
  0x23   : > { %p53_p9 = scmp.eq.s32.totalorder %s1804_s23, 0  ;;  %s2631_s7 = smov (%p34_p2, %s33_s7), 0 }
  0x24   : > { %2611 = sst [smem:[#allocation16_spill]] %s2631_s7  ;;  %p2613_p13 = scmp.eq.s32.totalorder %s1875_s24, 1 }
  0x25   : > { %p1924_p12 = por %p53_p9, %p52_p6  ;;  %s40_s16 = ssub.s32 %s1800_s22, %s2631_s7 }
  0x26   : > { %p1930_p0 = por %p2613_p13, %p52_p6  ;;  %p43_p3 = scmp.eq.s32.totalorder %s40_s16, 0 }
  0x27   : > { %1501 = dma.hbm_to_vmem [thread:$0]  (!%p1903_p11), %s2610_s3, 2048, %s204_s30, [#allocation6], %s2594_s9, %s2594_s9, %s2595_s10  }
  0x28   : > { %p1514_p11 = scmp.lt.s32.totalorder %s1804_s23, 2  ;;  %s1938_s17 = sand.u32 1, %s1792_s20  }
  0x29   : > { %s1310_s25 = sshll.u32 %s1938_s17, 8  ;;  %s1326_s30 = sshll.u32 %s1800_s22, 12 }
  0x2a   : > { %s1942_s29 = scalar_select %p43_p3, %s1792_s20, %s45_s13  }
  0x2b   : > { %s2616_s0 = sld [smem:[#allocation18_spill]]  ;;  %s224_s12 = scalar_lea.vmem [#allocation2], %s1310_s25 }
  0x2c   : > { %2615 = sst [smem:[#allocation17_spill]] %s1942_s29  ;;  %s233_s9 = sshll.u32 %s224_s12, 4  ;;  %s234_s9 = int_to_ptr.vmem [resolvable:$true] %s233_s9 }
  0x2d   : > { %p1950_p5 = pnand %p1514_p11, %p1924_p12  ;;  %s243_s16 = sand.u32 1, %s1804_s23  }
  0x2e   : > { %s221_s3 = scalar_lea.sflag [#allocation3], %s1938_s17  ;;  %s1673_s13 = scalar_lea.vmem %s234_s9, 4096 }
  0x2f   : > { %p1662_p7 = pneg %p1950_p5  ;;  %p1674_p2 = scmp.ne.s32.totalorder %s234_s9, %s1673_s13 }
  0x30   : > { %s1809_s25 = smov [#allocation2]  }
  0x31   : > { %s232_s11 = scalar_lea.hbm %s2616_s0, %s1326_s30  ;;  %p1676_p6 = pnand %p1674_p2, %p1662_p7 }
  0x32   : > { %s1678_s30 = sshll.u32 %s1809_s25, 4  ;;  %s1679_s30 = int_to_ptr.vmem [resolvable:$false] %s1678_s30 }
  0x33   : > { %p1677_p9 = pneg %p1676_p6  ;;  %s1680_s14 = scalar_lea.vmem %s1679_s30, 8192 }
  0x34   : > { %p1681_p12 = scmp.lt.s32.totalorder %s234_s9, %s1679_s30  ;;  %p1682_p13 = scmp.lt.s32.totalorder %s1680_s14, %s1673_s13 }
  0x36   : > { %p1683_p11 = por %p1682_p13, %p1681_p12 }
  0x38   : > { %p1684_p3 = pnand %p1683_p11, %p1677_p9 }
  0x3a   : > { %1687 = shalt.err (!%p1684_p3)
}
  0x3b   : > { %s2618_s6 = smov 8   ;;  %s2619_s8 = smov 128  }
  0x3c   : > { %1505 = dma.hbm_to_vmem [thread:$0]  (!%p1950_p5), %s232_s11, 4096, %s234_s9, %s221_s3, %s2619_s8, %s2619_s8, %s2618_s6  }
  0x3d   : > { %s1313_s12 = sshll.u32 %s1800_s22, 4  ;;  %s246_s0 = scalar_lea.vmem [#allocation5], %s1938_s17 }
  0x3e   : > { %s253_s7 = sshll.u32 %s246_s0, 4  ;;  %s251_s30 = scalar_lea.hbm %s2589_s1, %s1313_s12  ;;  %s254_s7 = int_to_ptr.vmem [resolvable:$true] %s253_s7 }
  0x3f   : > { %s244_s13 = scalar_lea.sflag [#allocation6], %s243_s16  ;;  %s1701_s14 = scalar_lea.vmem %s254_s7, 16 }
  0x40   : > { %p1702_p2 = scmp.ne.s32.totalorder %s254_s7, %s1701_s14  ;;  %s1810_s20 = smov [#allocation5]  }
  0x41   : > { %s1706_s23 = sshll.u32 %s1810_s20, 4  ;;  %s1707_s23 = int_to_ptr.vmem [resolvable:$false] %s1706_s23 }
  0x42   : > { %p1704_p6 = pnand %p1702_p2, %p1662_p7  ;;  %s1708_s27 = scalar_lea.vmem %s1707_s23, 32 }
  0x43   : > { %p1709_p12 = scmp.lt.s32.totalorder %s254_s7, %s1707_s23  ;;  %p1710_p13 = scmp.lt.s32.totalorder %s1708_s27, %s1701_s14 }
  0x44   : > { %p1705_p9 = pneg %p1704_p6 }
  0x45   : > { %p1711_p11 = por %p1710_p13, %p1709_p12 }
  0x47   : > { %p1712_p3 = pnand %p1711_p11, %p1705_p9 }
  0x49   : > { %1715 = shalt.err (!%p1712_p3)
}
  0x4a   : > { %1508 = dma.hbm_to_vmem [thread:$0]  (!%p1950_p5), %s251_s30, 16, %s254_s7, %s244_s13  }
  0x4b   : > { %268 = sbr.rel (%p1894_p8) target bundleno = 589 (0x24d), region = 40  ;;  %s1979_s0 = sand.u32 (!%p1894_p8), 1, %s1788_s19  }
  0x4c   : > { %s1315_s3 = sshll.u32 (!%p1894_p8), %s1979_s0, 8  ;;  %s271_s20 = scalar_lea.sflag (!%p1894_p8), [#allocation3], %s1979_s0 }
  0x4d   : > { %s1985_s23 = scalar_lea.vmem (!%p1894_p8), [#allocation2], %s1315_s3 }
  0x50   : > { %1767 = dma.done.wait (%p1884_p4), %s271_s20, 4096  }
  0x51   : > { %1769 = vsyncadd (%p1884_p4), %s271_s20, 4294963200  ;;  %s279_s27 = sand.u32 1, %s1875_s24   ;;  %s282_s7 = scalar_lea.vmem [#allocation5], %s1979_s0 }
  0x52   : > { %s280_s28 = scalar_lea.sflag [#allocation6], %s279_s27 }
  0x53   : > { %1771 = dma.done.wait (%p1884_p4), %s280_s28, 16  }
  0x54   : > { %1773 = vsyncadd (%p1884_p4), %s280_s28, 4294967280 }
  0x55   : > { %1775 = dma.done.wait (%p59_p1), [#allocation6], 2048  }
  0x56   : > { %1777 = vsyncadd (%p59_p1), [#allocation6], 4294965248  ;;  %v2002_v0 = vld [vmem:[%s1985_s23 + $0x8] sm:$0xff]  ;;  %v2005_v1 = vld [vmem:[%s1985_s23] sm:$0xff]  ;;  %p321_p1 = scmp.lt.s32.totalorder %s1796_s21, 1  ;;  %s2469_s11 = scalar_lea.vmem [#allocation8], %s1315_s3 }
  0x57   : > { %359 = vadd.xlane.f32.xlu1 %v2002_v0  ;;  %357 = vadd.xlane.f32.xlu0 %v2005_v1  ;;  %v2010_v2 = vld [vmem:[%s1985_s23 + $0x88] sm:$0xff]  ;;  %v2013_v3 = vld [vmem:[%s1985_s23 + $0x80] sm:$0xff]  ;;  %v454_v5 = vmul.f32 %v2005_v1, %v2005_v1  ;;  %v455_v7 = vmul.f32 %v2002_v0, %v2002_v0  ;;  %v2026_v8 = vld [vmem:[%s1985_s23 + $0x90] sm:$0xff]  ;;  %s1327_s16 = sshll.u32 %s1796_s21, 12  ;;  %s1180_s6 = sshll.u32 %s2469_s11, 4  ;;  %s2536_s6 = int_to_ptr.vmem [resolvable:$true] %s1180_s6 }
  0x58   : > { %v470_v4 = vmul.f32 %v2013_v3, %v2013_v3  ;;  %v471_v6 = vmul.f32 %v2010_v2, %v2010_v2  ;;  %v2029_v9 = vld [vmem:[%s1985_s23 + $0x10] sm:$0xff]  ;;  %v2034_v10 = vld [vmem:[%s1985_s23 + $0x98] sm:$0xff]  ;;  %v472_v13 = vmul.f32 %v2026_v8, %v2026_v8  ;;  %v896_v19 = vld [vmem:[#allocation7 + $0x60] sm:$0xff]  ;;  %s322_s24 = scalar_select %p321_p1, %s1796_s21, 1 }
  0x59   : > { %v2037_v11 = vld [vmem:[%s1985_s23 + $0x18] sm:$0xff]  ;;  %v456_v14 = vmul.f32 %v2029_v9, %v2029_v9  ;;  %v897_v16 = vld [vmem:[#allocation7 + $0x68] sm:$0xff]  ;;  %v473_v17 = vmul.f32 %v2034_v10, %v2034_v10  ;;  %v2050_v21 = vld [vmem:[%s1985_s23 + $0xa0] sm:$0xff]  ;;  %s2534_s25 = scalar_lea.hbm %s2593_s5, %s1327_s16  ;;  %s1165_s21 = scalar_lea.sflag [#allocation4], %s1979_s0 }
  0x5a   : > { %v899_v12 = vld [vmem:[#allocation7 + $0x78] sm:$0xff]  ;;  %v898_v15 = vld [vmem:[#allocation7 + $0x70] sm:$0xff]  ;;  %v457_v18 = vmul.f32 %v2037_v11, %v2037_v11  ;;  %v893_v24 = vld [vmem:[#allocation7 + $0x48] sm:$0xff]  ;;  %v474_v28 = vmul.f32 %v2050_v21, %v2050_v21  ;;  %s323_s10 = scalar_lea.vmem %s2590_s2, %s322_s24  ;;  %s1716_s30 = scalar_lea.vmem %s2536_s6, 4096 }
  0x5b   : > { %391 = vadd.xlane.f32.xlu1 %v2010_v2  ;;  %389 = vadd.xlane.f32.xlu0 %v2013_v3  ;;  %v895_v20 = vld [vmem:[#allocation7 + $0x58] sm:$0xff]  ;;  %v894_v23 = vld [vmem:[#allocation7 + $0x50] sm:$0xff]  ;;  %v2058_v25 = vld [vmem:[%s1985_s23 + $0xa8] sm:$0xff]  ;;  %p1717_p4 = scmp.ne.s32.totalorder %s2536_s6, %s1716_s30  ;;  %s1811_s13 = smov [#allocation8]  }
  0x5c   : > { %1376 = vmatprep.subr.mxu0 %v899_v12  ;;  %1456 = vmatprep.subr.mxu1 %v899_v12  ;;  %v2053_v22 = vld [vmem:[%s1985_s23 + $0x20] sm:$0xff]  ;;  %v2061_v26 = vld [vmem:[%s1985_s23 + $0x28] sm:$0xff]  ;;  %v475_v31 = vmul.f32 %v2058_v25, %v2058_v25  ;;  %v890_v33 = vld [vmem:[#allocation7 + $0x30] sm:$0xff]  ;;  %s1720_s14 = sshll.u32 %s1811_s13, 4  ;;  %s1721_s14 = int_to_ptr.vmem [resolvable:$false] %s1720_s14 }
  0x5d   : > { %1377 = vmatpush3.msra.mxu0 %v899_v12  ;;  %1472 = vmatpush3.msra.mxu1 %v899_v12  ;;  %v892_v27 = vld [vmem:[#allocation7 + $0x40] sm:$0xff]  ;;  %v458_v29 = vmul.f32 %v2053_v22, %v2053_v22  ;;  %v891_v30 = vld [vmem:[#allocation7 + $0x38] sm:$0xff]  ;;  %v459_v32 = vmul.f32 %v2061_v26, %v2061_v26  ;;  %v889_v34 = vld [vmem:[#allocation7 + $0x28] sm:$0xff]  ;;  %p1718_p8 = pnand %p1717_p4, %p1930_p0  ;;  %s1722_s3 = scalar_lea.vmem %s1721_s14, 8192 }
  0x5e   : > { %1378 = vmatprep.subr.mxu0 %v898_v15  ;;  %1457 = vmatprep.subr.mxu1 %v898_v15  ;;  %v2074_v35 = vld [vmem:[%s1985_s23 + $0xb0] sm:$0xff]  ;;  %v888_v37 = vld [vmem:[#allocation7 + $0x20] sm:$0xff]  ;;  %v887_v38 = vld [vmem:[#allocation7 + $0x18] sm:$0xff]  ;;  %p1723_p7 = scmp.lt.s32.totalorder %s2536_s6, %s1721_s14  ;;  %p1724_p2 = scmp.lt.s32.totalorder %s1722_s3, %s1716_s30 }
  0x5f   : > { %518 = vadd.xlane.f32.xlu1 %v470_v4  ;;  %486 = vadd.xlane.f32.xlu0 %v454_v5  ;;  %v2077_v36 = vld [vmem:[%s1985_s23 + $0x30] sm:$0xff]  ;;  %v2082_v39 = vld [vmem:[%s1985_s23 + $0xb8] sm:$0xff]  ;;  %v476_v42 = vmul.f32 %v2074_v35, %v2074_v35  ;;  %v884_v47 = vld [vmem:[#allocation7] sm:$0xff]  ;;  %p1719_p5 = pneg %p1718_p8 }
  0x60   : > { %1379 = vmatpush3.msra.mxu0 %v898_v15  ;;  %1473 = vmatpush3.msra.mxu1 %v898_v15  ;;  %v2085_v40 = vld [vmem:[%s1985_s23 + $0x38] sm:$0xff]  ;;  %v460_v43 = vmul.f32 %v2077_v36, %v2077_v36  ;;  %v885_v44 = vld [vmem:[#allocation7 + $0x8] sm:$0xff]  ;;  %v477_v45 = vmul.f32 %v2082_v39, %v2082_v39  ;;  %v2098_v48 = vld [vmem:[%s1985_s23 + $0xc0] sm:$0xff]  ;;  %p1725_p6 = por %p1724_p2, %p1723_p7 }
  0x61   : > { %1380 = vmatprep.subr.mxu0 %v897_v16  ;;  %1458 = vmatprep.subr.mxu1 %v897_v16  ;;  %v886_v41 = vld [vmem:[#allocation7 + $0x10] sm:$0xff]  ;;  %v461_v46 = vmul.f32 %v2085_v40, %v2085_v40  ;;  %v2101_v49 = vld [vmem:[%s1985_s23 + $0x40] sm:$0xff]  ;;  %v2106_v50 = vld [vmem:[%s1985_s23 + $0xc8] sm:$0xff]  ;;  %v478_v52 = vmul.f32 %v2098_v48, %v2098_v48 }
  0x62   : > { %1381 = vmatpush3.msra.mxu0 %v897_v16  ;;  %1474 = vmatpush3.msra.mxu1 %v897_v16  ;;  %v2109_v51 = vld [vmem:[%s1985_s23 + $0x48] sm:$0xff]  ;;  %v462_v53 = vmul.f32 %v2101_v49, %v2101_v49  ;;  %v479_v54 = vmul.f32 %v2106_v50, %v2106_v50  ;;  %v2122_v56 = vld [vmem:[%s1985_s23 + $0xd0] sm:$0xff]  ;;  %v2130_v58 = vld [vmem:[%s1985_s23 + $0xd8] sm:$0xff]  ;;  %p1726_p9 = pnand %p1725_p6, %p1719_p5 }
  0x63   : > { %520 = vadd.xlane.f32.xlu1 %v471_v6  ;;  %488 = vadd.xlane.f32.xlu0 %v455_v7  ;;  %v463_v55 = vmul.f32 %v2109_v51, %v2109_v51  ;;  %v2125_v57 = vld [vmem:[%s1985_s23 + $0x50] sm:$0xff]  ;;  %v2133_v59 = vld [vmem:[%s1985_s23 + $0x58] sm:$0xff]  ;;  %v480_v60 = vmul.f32 %v2122_v56, %v2122_v56  ;;  %v481_v62 = vmul.f32 %v2130_v58, %v2130_v58  ;;  %v2146_v4 = vld [vmem:[%s1985_s23 + $0xe0] sm:$0xff] }
  0x64   : > { %1382 = vmatprep.subr.mxu0 %v896_v19  ;;  %1459 = vmatprep.subr.mxu1 %v896_v19  ;;  %v464_v61 = vmul.f32 %v2125_v57, %v2125_v57  ;;  %v465_v63 = vmul.f32 %v2133_v59, %v2133_v59  ;;  %v2149_v5 = vld [vmem:[%s1985_s23 + $0x60] sm:$0xff]  ;;  %v2154_v6 = vld [vmem:[%s1985_s23 + $0xe8] sm:$0xff]  ;;  %v482_v12 = vmul.f32 %v2146_v4, %v2146_v4  ;;  %v2170_v16 = vld [vmem:[%s1985_s23 + $0xf0] sm:$0xff] }
  0x65   : > { %1383 = vmatpush3.msra.mxu0 %v896_v19  ;;  %1475 = vmatpush3.msra.mxu1 %v896_v19  ;;  %v2157_v7 = vld [vmem:[%s1985_s23 + $0x68] sm:$0xff]  ;;  %v2181_v19 = vld [vmem:[%s1985_s23 + $0x78] sm:$0xff] }
  0x66   : > { %1384 = vmatprep.subr.mxu0 %v895_v20  ;;  %1460 = vmatprep.subr.mxu1 %v895_v20  ;;  %v467_v15 = vmul.f32 %v2157_v7, %v2157_v7 }
  0x67   : > { %393 = vadd.xlane.f32.xlu1 %v2026_v8  ;;  %361 = vadd.xlane.f32.xlu0 %v2029_v9 }
  0x68   : > { %1385 = vmatpush3.msra.mxu0 %v895_v20  ;;  %1476 = vmatpush3.msra.mxu1 %v895_v20  ;;  %v484_v20 = vmul.f32 %v2170_v16, %v2170_v16 }
  0x69   : > { %1386 = vmatprep.subr.mxu0 %v894_v23  ;;  %1461 = vmatprep.subr.mxu1 %v894_v23 }
  0x6a   : > { %1387 = vmatpush3.msra.mxu0 %v894_v23  ;;  %1477 = vmatpush3.msra.mxu1 %v894_v23 }
  0x6b   : > { %395 = vadd.xlane.f32.xlu1 %v2034_v10  ;;  %363 = vadd.xlane.f32.xlu0 %v2037_v11 }
  0x6c   : > { %1388 = vmatprep.subr.mxu0 %v893_v24  ;;  %1462 = vmatprep.subr.mxu1 %v893_v24 }
  0x6d   : > { %1389 = vmatpush3.msra.mxu0 %v893_v24  ;;  %1478 = vmatpush3.msra.mxu1 %v893_v24 }
  0x6e   : > { %1390 = vmatprep.subr.mxu0 %v892_v27  ;;  %1463 = vmatprep.subr.mxu1 %v892_v27 }
  0x6f   : > { %522 = vadd.xlane.f32.xlu1 %v472_v13  ;;  %490 = vadd.xlane.f32.xlu0 %v456_v14  ;;  %v466_v13 = vmul.f32 %v2149_v5, %v2149_v5  ;;  %v483_v14 = vmul.f32 %v2154_v6, %v2154_v6 }
  0x70   : > { %1391 = vmatpush3.msra.mxu0 %v892_v27  ;;  %1479 = vmatpush3.msra.mxu1 %v892_v27  ;;  %v469_v27 = vmul.f32 %v2181_v19, %v2181_v19 }
  0x71   : > { %1392 = vmatprep.subr.mxu0 %v891_v30  ;;  %1464 = vmatprep.subr.mxu1 %v891_v30 }
  0x72   : > { %1393 = vmatpush3.msra.mxu0 %v891_v30  ;;  %1480 = vmatpush3.msra.mxu1 %v891_v30 }
  0x73   : > { %524 = vadd.xlane.f32.xlu1 %v473_v17  ;;  %492 = vadd.xlane.f32.xlu0 %v457_v18  ;;  %v2173_v17 = vld [vmem:[%s1985_s23 + $0x70] sm:$0xff]  ;;  %v2178_v18 = vld [vmem:[%s1985_s23 + $0xf8] sm:$0xff] }
  0x74   : > { %1394 = vmatprep.subr.mxu0 %v890_v33  ;;  %1465 = vmatprep.subr.mxu1 %v890_v33  ;;  %v468_v23 = vmul.f32 %v2173_v17, %v2173_v17  ;;  %v485_v24 = vmul.f32 %v2178_v18, %v2178_v18 }
  0x75   : > { %1395 = vmatpush3.msra.mxu0 %v890_v33  ;;  %1481 = vmatpush3.msra.mxu1 %v890_v33 }
  0x76   : > { %1396 = vmatprep.subr.mxu0 %v889_v34  ;;  %1466 = vmatprep.subr.mxu1 %v889_v34 }
  0x77   : > { %397 = vadd.xlane.f32.xlu1 %v2050_v21  ;;  %365 = vadd.xlane.f32.xlu0 %v2053_v22 }
  0x78   : > { %1397 = vmatpush3.msra.mxu0 %v889_v34  ;;  %1482 = vmatpush3.msra.mxu1 %v889_v34 }
  0x79   : > { %1398 = vmatprep.subr.mxu0 %v888_v37  ;;  %1467 = vmatprep.subr.mxu1 %v888_v37 }
  0x7a   : > { %1399 = vmatpush3.msra.mxu0 %v888_v37  ;;  %1483 = vmatpush3.msra.mxu1 %v888_v37 }
  0x7b   : > { %399 = vadd.xlane.f32.xlu1 %v2058_v25  ;;  %367 = vadd.xlane.f32.xlu0 %v2061_v26 }
  0x7c   : > { %1400 = vmatprep.subr.mxu0 %v887_v38  ;;  %1468 = vmatprep.subr.mxu1 %v887_v38 }
  0x7d   : > { %1401 = vmatpush3.msra.mxu0 %v887_v38  ;;  %1484 = vmatpush3.msra.mxu1 %v887_v38 }
  0x7e   : > { %1402 = vmatprep.subr.mxu0 %v886_v41  ;;  %1469 = vmatprep.subr.mxu1 %v886_v41 }
  0x7f   : > { %526 = vadd.xlane.f32.xlu1 %v474_v28  ;;  %494 = vadd.xlane.f32.xlu0 %v458_v29 }
  0x80   : > { %1403 = vmatpush3.msra.mxu0 %v886_v41  ;;  %1485 = vmatpush3.msra.mxu1 %v886_v41 }
  0x81   : > { %1404 = vmatprep.subr.mxu0 %v885_v44  ;;  %1470 = vmatprep.subr.mxu1 %v885_v44 }
  0x82   : > { %1405 = vmatpush3.msra.mxu0 %v885_v44  ;;  %1486 = vmatpush3.msra.mxu1 %v885_v44 }
  0x83   : > { %528 = vadd.xlane.f32.xlu1 %v475_v31  ;;  %496 = vadd.xlane.f32.xlu0 %v459_v32 }
  0x84   : > { %1406 = vmatprep.subr.mxu0 %v884_v47  ;;  %1471 = vmatprep.subr.mxu1 %v884_v47 }
  0x85   : > { %1407 = vmatpush3.msra.mxu0 %v884_v47  ;;  %1487 = vmatpush3.msra.mxu1 %v884_v47 }
  0x87   : > { %401 = vadd.xlane.f32.xlu1 %v2074_v35  ;;  %369 = vadd.xlane.f32.xlu0 %v2077_v36 }
  0x8b   : > { %403 = vadd.xlane.f32.xlu1 %v2082_v39  ;;  %371 = vadd.xlane.f32.xlu0 %v2085_v40 }
  0x8f   : > { %530 = vadd.xlane.f32.xlu1 %v476_v42  ;;  %498 = vadd.xlane.f32.xlu0 %v460_v43 }
  0x93   : > { %532 = vadd.xlane.f32.xlu1 %v477_v45  ;;  %500 = vadd.xlane.f32.xlu0 %v461_v46 }
  0x97   : > { %405 = vadd.xlane.f32.xlu1 %v2098_v48  ;;  %373 = vadd.xlane.f32.xlu0 %v2101_v49 }
  0x9b   : > { %407 = vadd.xlane.f32.xlu1 %v2106_v50  ;;  %375 = vadd.xlane.f32.xlu0 %v2109_v51 }
  0x9f   : > { %534 = vadd.xlane.f32.xlu1 %v478_v52  ;;  %502 = vadd.xlane.f32.xlu0 %v462_v53 }
  0xa3   : > { %536 = vadd.xlane.f32.xlu1 %v479_v54  ;;  %504 = vadd.xlane.f32.xlu0 %v463_v55 }
  0xa7   : > { %409 = vadd.xlane.f32.xlu1 %v2122_v56  ;;  %377 = vadd.xlane.f32.xlu0 %v2125_v57 }
  0xab   : > { %411 = vadd.xlane.f32.xlu1 %v2130_v58  ;;  %379 = vadd.xlane.f32.xlu0 %v2133_v59 }
  0xaf   : > { %538 = vadd.xlane.f32.xlu1 %v480_v60  ;;  %506 = vadd.xlane.f32.xlu0 %v464_v61 }
  0xb3   : > { %540 = vadd.xlane.f32.xlu1 %v481_v62  ;;  %508 = vadd.xlane.f32.xlu0 %v465_v63 }
  0xb7   : > { %413 = vadd.xlane.f32.xlu1 %v2146_v4  ;;  %381 = vadd.xlane.f32.xlu0 %v2149_v5 }
  0xbb   : > { %415 = vadd.xlane.f32.xlu1 %v2154_v6  ;;  %383 = vadd.xlane.f32.xlu0 %v2157_v7 }
  0xbf   : > { %542 = vadd.xlane.f32.xlu1 %v482_v12  ;;  %510 = vadd.xlane.f32.xlu0 %v466_v13 }
  0xc3   : > { %544 = vadd.xlane.f32.xlu1 %v483_v14  ;;  %512 = vadd.xlane.f32.xlu0 %v467_v15 }
  0xc7   : > { %417 = vadd.xlane.f32.xlu1 %v2170_v16  ;;  %385 = vadd.xlane.f32.xlu0 %v2173_v17 }
  0xcb   : > { %419 = vadd.xlane.f32.xlu1 %v2178_v18  ;;  %387 = vadd.xlane.f32.xlu0 %v2181_v19 }
  0xcf   : > { %546 = vadd.xlane.f32.xlu1 %v484_v20  ;;  %514 = vadd.xlane.f32.xlu0 %v468_v23 }
  0xd3   : > { %548 = vadd.xlane.f32.xlu1 %v485_v24  ;;  %516 = vadd.xlane.f32.xlu0 %v469_v27 }
  0xe0   : > { %v360_v28 = vpop.xlane.xlu1 %359  ;;  %v358_v29 = vpop.xlane.xlu0 %357 }
  0xe1   : > { %v2193_v32 = vmul.f32 0.0078125, %v358_v29  ;;  %v2197_v34 = vmul.f32 0.0078125, %v360_v28 }
  0xe3   : > { %v582_v42 = vmul.f32 %v2193_v32, %v2193_v32  ;;  %v583_v52 = vmul.f32 %v2197_v34, %v2197_v34 }
  0xe4   : > { %v392_v30 = vpop.xlane.xlu1 %391  ;;  %v390_v31 = vpop.xlane.xlu0 %389 }
  0xe5   : > { %v2195_v33 = vmul.f32 0.0078125, %v390_v31  ;;  %v2199_v37 = vmul.f32 0.0078125, %v392_v30 }
  0xe7   : > { %v598_v43 = vmul.f32 %v2195_v33, %v2195_v33  ;;  %v599_v53 = vmul.f32 %v2199_v37, %v2199_v37 }
  0xe8   : > { %v519_v38 = vpop.xlane.xlu1 %518  ;;  %v487_v41 = vpop.xlane.xlu0 %486 }
  0xe9   : > { %v566_v44 = vmul.f32 0.0078125, %v519_v38  ;;  %v550_v45 = vmul.f32 0.0078125, %v487_v41 }
  0xeb   : > { %v630_v46 = vsub.f32 %v566_v44, %v598_v43  ;;  %v614_v47 = vsub.f32 %v550_v45, %v582_v42 }
  0xec   : > { %v521_v54 = vpop.xlane.xlu1 %520  ;;  %v489_v55 = vpop.xlane.xlu0 %488 }
  0xed   : > { %v662_v60 = vmax.f32 %v630_v46, 0.0  ;;  %v646_v61 = vmax.f32 %v614_v47, 0.0  ;;  %v567_v62 = vmul.f32 0.0078125, %v521_v54  ;;  %v551_v63 = vmul.f32 0.0078125, %v489_v55 }
  0xef   : > { %v726_v12 = vadd.f32 1e-06, %v662_v60  ;;  %v710_v13 = vadd.f32 1e-06, %v646_v61  ;;  %v631_v14 = vsub.f32 %v567_v62, %v599_v53  ;;  %v615_v15 = vsub.f32 %v551_v63, %v583_v52 }
  0xf0   : > { %v394_v20 = vpop.xlane.xlu1 %393  ;;  %v362_v23 = vpop.xlane.xlu0 %361 }
  0xf1   : > { %1570 = vrsqrt.f32 %v726_v12  ;;  %v663_v24 = vmax.f32 %v631_v14, 0.0  ;;  %v647_v27 = vmax.f32 %v615_v15, 0.0  ;;  %v2210_v38 = vmul.f32 0.0078125, %v394_v20 }
  0xf2   : > { %1572 = vrsqrt.f32 %v710_v13  ;;  %v2212_v41 = vmul.f32 0.0078125, %v362_v23  ;;  %v678_v23 = vsub.f32 %v2005_v1, %v2193_v32 }
  0xf3   : > { %v727_v28 = vadd.f32 1e-06, %v663_v24  ;;  %v711_v29 = vadd.f32 1e-06, %v647_v27  ;;  %v600_v46 = vmul.f32 %v2210_v38, %v2210_v38  ;;  %v694_v24 = vsub.f32 %v2013_v3, %v2195_v33 }
  0xf4   : > { %v396_v30 = vpop.xlane.xlu1 %395  ;;  %v364_v31 = vpop.xlane.xlu0 %363  ;;  %v584_v47 = vmul.f32 %v2212_v41, %v2212_v41 }
  0xf5   : > { %1574 = vrsqrt.f32 %v727_v28  ;;  %v2214_v42 = vmul.f32 0.0078125, %v396_v30  ;;  %v2216_v43 = vmul.f32 0.0078125, %v364_v31 }
  0xf6   : > { %1576 = vrsqrt.f32 %v711_v29 }
  0xf7   : > { %v601_v60 = vmul.f32 %v2214_v42, %v2214_v42  ;;  %v585_v61 = vmul.f32 %v2216_v43, %v2216_v43 }
  0xf8   : > { %v523_v44 = vpop.xlane.xlu1 %522  ;;  %v491_v45 = vpop.xlane.xlu0 %490 }
  0xf9   : > { %v568_v52 = vmul.f32 0.0078125, %v523_v44  ;;  %v552_v53 = vmul.f32 0.0078125, %v491_v45  ;;  %v2234_v44 = vld [vmem:[%s323_s10] ss:$0 sm:$0xff] }
  0xfb   : > { %v632_v54 = vsub.f32 %v568_v52, %v600_v46  ;;  %v616_v55 = vsub.f32 %v552_v53, %v584_v47 }
  0xfc   : > { %v525_v62 = vpop.xlane.xlu1 %524  ;;  %v493_v63 = vpop.xlane.xlu0 %492 }
  0xfd   : > { %v664_v12 = vmax.f32 %v632_v54, 0.0  ;;  %v648_v13 = vmax.f32 %v616_v55, 0.0  ;;  %v569_v14 = vmul.f32 0.0078125, %v525_v62  ;;  %v553_v15 = vmul.f32 0.0078125, %v493_v63  ;;  %v2238_v55 = vld [vmem:[%s282_s7] ss:$0 sm:$0xff] }
  0xfe   : > { %v1571_v20 = vpop.eup %1570  ;;  %v695_v63 = vsub.f32 %v2010_v2, %v2199_v37 }
  0xff   : > { %v1573_v27 = vpop.eup %1572  ;;  %v728_v28 = vadd.f32 1e-06, %v664_v12  ;;  %v712_v29 = vadd.f32 1e-06, %v648_v13  ;;  %v633_v30 = vsub.f32 %v569_v14, %v601_v60  ;;  %v617_v31 = vsub.f32 %v553_v15, %v585_v61 }
 0x100   : > { %v398_v45 = vpop.xlane.xlu1 %397  ;;  %v366_v46 = vpop.xlane.xlu0 %365  ;;  %v774_v47 = vmul.f32 %v1573_v27, %v678_v23  ;;  %v790_v52 = vmul.f32 %v1571_v20, %v694_v24  ;;  %v679_v60 = vsub.f32 %v2002_v0, %v2197_v34 }
 0x101   : > { %1578 = vrsqrt.f32 %v728_v28  ;;  %v665_v53 = vmax.f32 %v633_v30, 0.0  ;;  %v649_v54 = vmax.f32 %v617_v31, 0.0  ;;  %v2248_v20 = vmul.f32 0.0078125, %v398_v45 }
 0x102   : > { %v1575_v1 = vpop.eup %1574  ;;  %1580 = vrsqrt.f32 %v712_v29  ;;  %v813_v3 = vmul.f32 %v2234_v44, %v774_v47  ;;  %v829_v32 = vmul.f32 %v2234_v44, %v790_v52  ;;  %v2250_v23 = vmul.f32 0.0078125, %v366_v46 }
 0x103   : > { %v1577_v33 = vpop.eup %1576  ;;  %v729_v61 = vadd.f32 1e-06, %v665_v53  ;;  %v713_v62 = vadd.f32 1e-06, %v649_v54  ;;  %v791_v0 = vmul.f32 %v1575_v1, %v695_v63  ;;  %v602_v30 = vmul.f32 %v2248_v20, %v2248_v20 }
 0x104   : > { %v400_v12 = vpop.xlane.xlu1 %399  ;;  %v368_v13 = vpop.xlane.xlu0 %367  ;;  %v852_v14 = vadd.f32 %v2238_v55, %v813_v3  ;;  %v868_v15 = vadd.f32 %v2238_v55, %v829_v32  ;;  %v775_v24 = vmul.f32 %v1577_v33, %v679_v60  ;;  %v586_v31 = vmul.f32 %v2250_v23, %v2250_v23 }
 0x105   : > { %1582 = vrsqrt.f32 %v729_v61  ;;  %v2252_v34 = vmul.f32 0.0078125, %v400_v12  ;;  %v2254_v27 = vmul.f32 0.0078125, %v368_v13  ;;  %v830_v29 = vmul.f32 %v2234_v44, %v791_v0 }
 0x106   : > { %1584 = vrsqrt.f32 %v713_v62  ;;  %1408 = vmatprep.mubr.f32.mxu0 %v852_v14  ;;  %1432 = vmatprep.mubr.f32.mxu1 %v868_v15  ;;  %v814_v28 = vmul.f32 %v2234_v44, %v775_v24  ;;  %v696_v13 = vsub.f32 %v2026_v8, %v2210_v38  ;;  %v680_v14 = vsub.f32 %v2029_v9, %v2212_v41 }
 0x107   : > { %v869_v52 = vadd.f32 %v2238_v55, %v830_v29  ;;  %v603_v1 = vmul.f32 %v2252_v34, %v2252_v34  ;;  %v587_v3 = vmul.f32 %v2254_v27, %v2254_v27  ;;  %v681_v9 = vsub.f32 %v2037_v11, %v2216_v43 }
 0x108   : > { %v527_v2 = vpop.xlane.xlu1 %526  ;;  %v495_v37 = vpop.xlane.xlu0 %494  ;;  %v853_v47 = vadd.f32 %v2238_v55, %v814_v28 }
 0x109   : > { %v570_v45 = vmul.f32 0.0078125, %v527_v2  ;;  %v554_v46 = vmul.f32 0.0078125, %v495_v37  ;;  %1433 = vmatmul.mubr.f32.vlgmr.msra.gmra.mxu1 %v869_v52 }
 0x10a   : > { %1409 = vmatmul.mubr.f32.vlgmr.msra.gmra.mxu0 %v853_v47 }
 0x10b   : > { %v634_v53 = vsub.f32 %v570_v45, %v602_v30  ;;  %v618_v54 = vsub.f32 %v554_v46, %v586_v31 }
 0x10c   : > { %v529_v32 = vpop.xlane.xlu1 %528  ;;  %v497_v33 = vpop.xlane.xlu0 %496 }
 0x10d   : > { %v666_v60 = vmax.f32 %v634_v53, 0.0  ;;  %v650_v61 = vmax.f32 %v618_v54, 0.0  ;;  %v571_v62 = vmul.f32 0.0078125, %v529_v32  ;;  %v555_v63 = vmul.f32 0.0078125, %v497_v33 }
 0x10e   : > { %v1579_v12 = vpop.eup %1578  ;;  %v697_v54 = vsub.f32 %v2034_v10, %v2214_v42 }
 0x10f   : > { %v1581_v15 = vpop.eup %1580  ;;  %v730_v24 = vadd.f32 1e-06, %v666_v60  ;;  %v714_v0 = vadd.f32 1e-06, %v650_v61  ;;  %v635_v2 = vsub.f32 %v571_v62, %v603_v1  ;;  %v619_v37 = vsub.f32 %v555_v63, %v587_v3 }
 0x110   : > { %v402_v28 = vpop.xlane.xlu1 %401  ;;  %v370_v29 = vpop.xlane.xlu0 %369  ;;  %v776_v30 = vmul.f32 %v1581_v15, %v680_v14  ;;  %v792_v31 = vmul.f32 %v1579_v12, %v696_v13 }
 0x111   : > { %1586 = vrsqrt.f32 %v730_v24  ;;  %v667_v45 = vmax.f32 %v635_v2, 0.0  ;;  %v651_v46 = vmax.f32 %v619_v37, 0.0  ;;  %v2280_v60 = vmul.f32 0.0078125, %v402_v28 }
 0x112   : > { %v1583_v47 = vpop.eup %1582  ;;  %1588 = vrsqrt.f32 %v714_v0  ;;  %v815_v52 = vmul.f32 %v2234_v44, %v776_v30  ;;  %v831_v8 = vmul.f32 %v2234_v44, %v792_v31  ;;  %v2282_v61 = vmul.f32 0.0078125, %v370_v29 }
 0x113   : > { %v1585_v38 = vpop.eup %1584  ;;  %v731_v41 = vadd.f32 1e-06, %v667_v45  ;;  %v715_v53 = vadd.f32 1e-06, %v651_v46  ;;  %v793_v11 = vmul.f32 %v1583_v47, %v697_v54  ;;  %v604_v14 = vmul.f32 %v2280_v60, %v2280_v60 }
 0x114   : > { %v404_v1 = vpop.xlane.xlu1 %403  ;;  %v372_v3 = vpop.xlane.xlu0 %371  ;;  %v854_v32 = vadd.f32 %v2238_v55, %v815_v52  ;;  %v870_v33 = vadd.f32 %v2238_v55, %v831_v8  ;;  %v777_v62 = vmul.f32 %v1585_v38, %v681_v9  ;;  %v588_v15 = vmul.f32 %v2282_v61, %v2282_v61 }
 0x115   : > { %1590 = vrsqrt.f32 %v731_v41  ;;  %v2284_v43 = vmul.f32 0.0078125, %v404_v1  ;;  %v2286_v63 = vmul.f32 0.0078125, %v372_v3  ;;  %v832_v13 = vmul.f32 %v2234_v44, %v793_v11 }
 0x116   : > { %1592 = vrsqrt.f32 %v715_v53  ;;  %1411 = vmatprep.mubr.f32.mxu0 %v854_v32  ;;  %1435 = vmatprep.mubr.f32.mxu1 %v870_v33  ;;  %v816_v12 = vmul.f32 %v2234_v44, %v777_v62  ;;  %v698_v41 = vsub.f32 %v2050_v21, %v2248_v20  ;;  %v682_v53 = vsub.f32 %v2053_v22, %v2250_v23 }
 0x117   : > { %v871_v37 = vadd.f32 %v2238_v55, %v832_v13  ;;  %v605_v30 = vmul.f32 %v2284_v43, %v2284_v43  ;;  %v589_v31 = vmul.f32 %v2286_v63, %v2286_v63  ;;  %v683_v22 = vsub.f32 %v2061_v26, %v2254_v27 }
 0x118   : > { %v531_v10 = vpop.xlane.xlu1 %530  ;;  %v499_v42 = vpop.xlane.xlu0 %498  ;;  %v855_v2 = vadd.f32 %v2238_v55, %v816_v12 }
 0x119   : > { %v572_v24 = vmul.f32 0.0078125, %v531_v10  ;;  %v556_v0 = vmul.f32 0.0078125, %v499_v42  ;;  %1436 = vmatmul.mubr.f32.gmra.mxu1 %v871_v37 }
 0x11a   : > { %1412 = vmatmul.mubr.f32.gmra.mxu0 %v855_v2 }
 0x11b   : > { %v636_v28 = vsub.f32 %v572_v24, %v604_v14  ;;  %v620_v29 = vsub.f32 %v556_v0, %v588_v15  ;;  %v699_v0 = vsub.f32 %v2058_v25, %v2252_v34 }
 0x11c   : > { %v533_v45 = vpop.xlane.xlu1 %532  ;;  %v501_v46 = vpop.xlane.xlu0 %500 }
 0x11d   : > { %v668_v47 = vmax.f32 %v636_v28, 0.0  ;;  %v652_v52 = vmax.f32 %v620_v29, 0.0  ;;  %v573_v8 = vmul.f32 0.0078125, %v533_v45  ;;  %v557_v38 = vmul.f32 0.0078125, %v501_v46 }
 0x11e   : > { %v1587_v9 = vpop.eup %1586 }
 0x11f   : > { %v1589_v54 = vpop.eup %1588  ;;  %v732_v1 = vadd.f32 1e-06, %v668_v47  ;;  %v716_v3 = vadd.f32 1e-06, %v652_v52  ;;  %v637_v32 = vsub.f32 %v573_v8, %v605_v30  ;;  %v621_v33 = vsub.f32 %v557_v38, %v589_v31 }
 0x120   : > { %v406_v62 = vpop.xlane.xlu1 %405  ;;  %v374_v11 = vpop.xlane.xlu0 %373  ;;  %v778_v10 = vmul.f32 %v1589_v54, %v682_v53  ;;  %v794_v42 = vmul.f32 %v1587_v9, %v698_v41 }
 0x121   : > { %1594 = vrsqrt.f32 %v732_v1  ;;  %v669_v12 = vmax.f32 %v637_v32, 0.0  ;;  %v653_v13 = vmax.f32 %v621_v33, 0.0  ;;  %v2312_v30 = vmul.f32 0.0078125, %v406_v62 }
 0x122   : > { %v1591_v14 = vpop.eup %1590  ;;  %1596 = vrsqrt.f32 %v716_v3  ;;  %v817_v15 = vmul.f32 %v2234_v44, %v778_v10  ;;  %v833_v21 = vmul.f32 %v2234_v44, %v794_v42  ;;  %v2314_v31 = vmul.f32 0.0078125, %v374_v11 }
 0x123   : > { %v1593_v20 = vpop.eup %1592  ;;  %v733_v23 = vadd.f32 1e-06, %v669_v12  ;;  %v717_v24 = vadd.f32 1e-06, %v653_v13  ;;  %v795_v26 = vmul.f32 %v1591_v14, %v699_v0  ;;  %v606_v8 = vmul.f32 %v2312_v30, %v2312_v30 }
 0x124   : > { %v408_v2 = vpop.xlane.xlu1 %407  ;;  %v376_v37 = vpop.xlane.xlu0 %375  ;;  %v856_v28 = vadd.f32 %v2238_v55, %v817_v15  ;;  %v872_v29 = vadd.f32 %v2238_v55, %v833_v21  ;;  %v779_v45 = vmul.f32 %v1593_v20, %v683_v22  ;;  %v590_v38 = vmul.f32 %v2314_v31, %v2314_v31 }
 0x125   : > { %1598 = vrsqrt.f32 %v733_v23  ;;  %v2316_v27 = vmul.f32 0.0078125, %v408_v2  ;;  %v2318_v46 = vmul.f32 0.0078125, %v376_v37  ;;  %v834_v52 = vmul.f32 %v2234_v44, %v795_v26 }
 0x126   : > { %1600 = vrsqrt.f32 %v717_v24  ;;  %1414 = vmatprep.mubr.f32.mxu0 %v856_v28  ;;  %1438 = vmatprep.mubr.f32.mxu1 %v872_v29  ;;  %v818_v47 = vmul.f32 %v2234_v44, %v779_v45  ;;  %v700_v15 = vsub.f32 %v2074_v35, %v2280_v60  ;;  %v684_v21 = vsub.f32 %v2077_v36, %v2282_v61 }
 0x127   : > { %v873_v54 = vadd.f32 %v2238_v55, %v834_v52  ;;  %v607_v32 = vmul.f32 %v2316_v27, %v2316_v27  ;;  %v591_v33 = vmul.f32 %v2318_v46, %v2318_v46  ;;  %v685_v36 = vsub.f32 %v2085_v40, %v2286_v63 }
 0x128   : > { %v535_v25 = vpop.xlane.xlu1 %534  ;;  %v503_v34 = vpop.xlane.xlu0 %502  ;;  %v857_v53 = vadd.f32 %v2238_v55, %v818_v47  ;;  %v701_v52 = vsub.f32 %v2082_v39, %v2284_v43 }
 0x129   : > { %v574_v9 = vmul.f32 0.0078125, %v535_v25  ;;  %v558_v41 = vmul.f32 0.0078125, %v503_v34  ;;  %1439 = vmatmul.mubr.f32.gmra.mxu1 %v873_v54 }
 0x12a   : > { %1415 = vmatmul.mubr.f32.gmra.mxu0 %v857_v53 }
 0x12b   : > { %v638_v1 = vsub.f32 %v574_v9, %v606_v8  ;;  %v622_v3 = vsub.f32 %v558_v41, %v590_v38 }
 0x12c   : > { %v537_v62 = vpop.xlane.xlu1 %536  ;;  %v505_v11 = vpop.xlane.xlu0 %504 }
 0x12d   : > { %v670_v10 = vmax.f32 %v638_v1, 0.0  ;;  %v654_v42 = vmax.f32 %v622_v3, 0.0  ;;  %v575_v12 = vmul.f32 0.0078125, %v537_v62  ;;  %v559_v13 = vmul.f32 0.0078125, %v505_v11 }
 0x12e   : > { %v1595_v14 = vpop.eup %1594 }
 0x12f   : > { %v1597_v20 = vpop.eup %1596  ;;  %v734_v22 = vadd.f32 1e-06, %v670_v10  ;;  %v718_v23 = vadd.f32 1e-06, %v654_v42  ;;  %v639_v24 = vsub.f32 %v575_v12, %v607_v32  ;;  %v623_v0 = vsub.f32 %v559_v13, %v591_v33 }
 0x130   : > { %v410_v2 = vpop.xlane.xlu1 %409  ;;  %v378_v37 = vpop.xlane.xlu0 %377  ;;  %v780_v28 = vmul.f32 %v1597_v20, %v684_v21  ;;  %v796_v29 = vmul.f32 %v1595_v14, %v700_v15 }
 0x131   : > { %1602 = vrsqrt.f32 %v734_v22  ;;  %v671_v45 = vmax.f32 %v639_v24, 0.0  ;;  %v655_v26 = vmax.f32 %v623_v0, 0.0  ;;  %v2344_v53 = vmul.f32 0.0078125, %v410_v2 }
 0x132   : > { %v1599_v25 = vpop.eup %1598  ;;  %1604 = vrsqrt.f32 %v718_v23  ;;  %v819_v34 = vmul.f32 %v2234_v44, %v780_v28  ;;  %v835_v35 = vmul.f32 %v2234_v44, %v796_v29  ;;  %v2346_v54 = vmul.f32 0.0078125, %v378_v37 }
 0x133   : > { %v1601_v60 = vpop.eup %1600  ;;  %v735_v61 = vadd.f32 1e-06, %v671_v45  ;;  %v719_v47 = vadd.f32 1e-06, %v655_v26  ;;  %v797_v40 = vmul.f32 %v1599_v25, %v701_v52  ;;  %v608_v62 = vmul.f32 %v2344_v53, %v2344_v53 }
 0x134   : > { %v412_v8 = vpop.xlane.xlu1 %411  ;;  %v380_v38 = vpop.xlane.xlu0 %379  ;;  %v858_v9 = vadd.f32 %v2238_v55, %v819_v34  ;;  %v874_v41 = vadd.f32 %v2238_v55, %v835_v35  ;;  %v781_v1 = vmul.f32 %v1601_v60, %v685_v36  ;;  %v592_v11 = vmul.f32 %v2346_v54, %v2346_v54 }
 0x135   : > { %1606 = vrsqrt.f32 %v735_v61  ;;  %v2348_v63 = vmul.f32 0.0078125, %v412_v8  ;;  %v2350_v3 = vmul.f32 0.0078125, %v380_v38  ;;  %v836_v33 = vmul.f32 %v2234_v44, %v797_v40 }
 0x136   : > { %1608 = vrsqrt.f32 %v719_v47  ;;  %1417 = vmatprep.mubr.f32.mxu0 %v858_v9  ;;  %1441 = vmatprep.mubr.f32.mxu1 %v874_v41  ;;  %v820_v32 = vmul.f32 %v2234_v44, %v781_v1  ;;  %v702_v29 = vsub.f32 %v2098_v48, %v2312_v30  ;;  %v686_v45 = vsub.f32 %v2101_v49, %v2314_v31 }
 0x137   : > { %v875_v13 = vadd.f32 %v2238_v55, %v836_v33  ;;  %v609_v21 = vmul.f32 %v2348_v63, %v2348_v63  ;;  %v593_v20 = vmul.f32 %v2350_v3, %v2350_v3  ;;  %v687_v49 = vsub.f32 %v2109_v51, %v2318_v46 }
 0x138   : > { %v539_v39 = vpop.xlane.xlu1 %538  ;;  %v507_v43 = vpop.xlane.xlu0 %506  ;;  %v859_v12 = vadd.f32 %v2238_v55, %v820_v32  ;;  %v703_v40 = vsub.f32 %v2106_v50, %v2316_v27 }
 0x139   : > { %v576_v10 = vmul.f32 0.0078125, %v539_v39  ;;  %v560_v42 = vmul.f32 0.0078125, %v507_v43  ;;  %1442 = vmatmul.mubr.f32.gmra.mxu1 %v875_v13 }
 0x13a   : > { %1418 = vmatmul.mubr.f32.gmra.mxu0 %v859_v12 }
 0x13b   : > { %v640_v14 = vsub.f32 %v576_v10, %v608_v62  ;;  %v624_v15 = vsub.f32 %v560_v42, %v592_v11 }
 0x13c   : > { %v541_v22 = vpop.xlane.xlu1 %540  ;;  %v509_v23 = vpop.xlane.xlu0 %508 }
 0x13d   : > { %v672_v24 = vmax.f32 %v640_v14, 0.0  ;;  %v656_v0 = vmax.f32 %v624_v15, 0.0  ;;  %v577_v2 = vmul.f32 0.0078125, %v541_v22  ;;  %v561_v37 = vmul.f32 0.0078125, %v509_v23 }
 0x13e   : > { %v1603_v28 = vpop.eup %1602 }
 0x13f   : > { %v1605_v26 = vpop.eup %1604  ;;  %v736_v25 = vadd.f32 1e-06, %v672_v24  ;;  %v720_v34 = vadd.f32 1e-06, %v656_v0  ;;  %v641_v35 = vsub.f32 %v577_v2, %v609_v21  ;;  %v625_v60 = vsub.f32 %v561_v37, %v593_v20 }
 0x140   : > { %v414_v36 = vpop.xlane.xlu1 %413  ;;  %v382_v61 = vpop.xlane.xlu0 %381  ;;  %v782_v47 = vmul.f32 %v1605_v26, %v686_v45  ;;  %v798_v52 = vmul.f32 %v1603_v28, %v702_v29 }
 0x141   : > { %1610 = vrsqrt.f32 %v736_v25  ;;  %v673_v8 = vmax.f32 %v641_v35, 0.0  ;;  %v657_v38 = vmax.f32 %v625_v60, 0.0  ;;  %v2376_v62 = vmul.f32 0.0078125, %v414_v36 }
 0x142   : > { %v1607_v9 = vpop.eup %1606  ;;  %1612 = vrsqrt.f32 %v720_v34  ;;  %v821_v41 = vmul.f32 %v2234_v44, %v782_v47  ;;  %v837_v48 = vmul.f32 %v2234_v44, %v798_v52  ;;  %v2378_v11 = vmul.f32 0.0078125, %v382_v61 }
 0x143   : > { %v1609_v30 = vpop.eup %1608  ;;  %v737_v31 = vadd.f32 1e-06, %v673_v8  ;;  %v721_v1 = vadd.f32 1e-06, %v657_v38  ;;  %v799_v51 = vmul.f32 %v1607_v9, %v703_v40  ;;  %v610_v14 = vmul.f32 %v2376_v62, %v2376_v62 }
 0x144   : > { %v416_v39 = vpop.xlane.xlu1 %415  ;;  %v384_v43 = vpop.xlane.xlu0 %383  ;;  %v860_v32 = vadd.f32 %v2238_v55, %v821_v41  ;;  %v876_v33 = vadd.f32 %v2238_v55, %v837_v48  ;;  %v783_v10 = vmul.f32 %v1609_v30, %v687_v49  ;;  %v594_v15 = vmul.f32 %v2378_v11, %v2378_v11 }
 0x145   : > { %1614 = vrsqrt.f32 %v737_v31  ;;  %v2380_v46 = vmul.f32 0.0078125, %v416_v39  ;;  %v2382_v42 = vmul.f32 0.0078125, %v384_v43  ;;  %v838_v13 = vmul.f32 %v2234_v44, %v799_v51 }
 0x146   : > { %1616 = vrsqrt.f32 %v721_v1  ;;  %1420 = vmatprep.mubr.f32.mxu0 %v860_v32  ;;  %1444 = vmatprep.mubr.f32.mxu1 %v876_v33  ;;  %v822_v12 = vmul.f32 %v2234_v44, %v783_v10  ;;  %v704_v60 = vsub.f32 %v2122_v56, %v2344_v53  ;;  %v688_v36 = vsub.f32 %v2125_v57, %v2346_v54 }
 0x147   : > { %v877_v23 = vadd.f32 %v2238_v55, %v838_v13  ;;  %v611_v2 = vmul.f32 %v2380_v46, %v2380_v46  ;;  %v595_v37 = vmul.f32 %v2382_v42, %v2382_v42  ;;  %v689_v57 = vsub.f32 %v2133_v59, %v2350_v3 }
 0x148   : > { %v543_v50 = vpop.xlane.xlu1 %542  ;;  %v511_v27 = vpop.xlane.xlu0 %510  ;;  %v861_v22 = vadd.f32 %v2238_v55, %v822_v12  ;;  %v705_v43 = vsub.f32 %v2130_v58, %v2348_v63 }
 0x149   : > { %v578_v21 = vmul.f32 0.0078125, %v543_v50  ;;  %v562_v20 = vmul.f32 0.0078125, %v511_v27  ;;  %1445 = vmatmul.mubr.f32.gmra.mxu1 %v877_v23 }
 0x14a   : > { %1421 = vmatmul.mubr.f32.gmra.mxu0 %v861_v22 }
 0x14b   : > { %v642_v24 = vsub.f32 %v578_v21, %v610_v14  ;;  %v626_v0 = vsub.f32 %v562_v20, %v594_v15 }
 0x14c   : > { %v545_v28 = vpop.xlane.xlu1 %544  ;;  %v513_v29 = vpop.xlane.xlu0 %512 }
 0x14d   : > { %v674_v45 = vmax.f32 %v642_v24, 0.0  ;;  %v658_v26 = vmax.f32 %v626_v0, 0.0  ;;  %v579_v25 = vmul.f32 0.0078125, %v545_v28  ;;  %v563_v34 = vmul.f32 0.0078125, %v513_v29 }
 0x14e   : > { %v1611_v35 = vpop.eup %1610 }
 0x14f   : > { %v1613_v61 = vpop.eup %1612  ;;  %v738_v47 = vadd.f32 1e-06, %v674_v45  ;;  %v722_v52 = vadd.f32 1e-06, %v658_v26  ;;  %v643_v8 = vsub.f32 %v579_v25, %v611_v2  ;;  %v627_v38 = vsub.f32 %v563_v34, %v595_v37 }
 0x150   : > { %v418_v9 = vpop.xlane.xlu1 %417  ;;  %v386_v41 = vpop.xlane.xlu0 %385  ;;  %v784_v48 = vmul.f32 %v1613_v61, %v688_v36  ;;  %v800_v30 = vmul.f32 %v1611_v35, %v704_v60  ;;  %v706_v61 = vsub.f32 %v2146_v4, %v2376_v62  ;;  %v691_v4 = vsub.f32 %v2157_v7, %v2382_v42 }
 0x151   : > { %1618 = vrsqrt.f32 %v738_v47  ;;  %v675_v49 = vmax.f32 %v643_v8, 0.0  ;;  %v659_v31 = vmax.f32 %v627_v38, 0.0  ;;  %v2408_v50 = vmul.f32 0.0078125, %v418_v9 }
 0x152   : > { %v1615_v1 = vpop.eup %1614  ;;  %1620 = vrsqrt.f32 %v722_v52  ;;  %v823_v40 = vmul.f32 %v2234_v44, %v784_v48  ;;  %v839_v56 = vmul.f32 %v2234_v44, %v800_v30  ;;  %v2410_v27 = vmul.f32 0.0078125, %v386_v41 }
 0x153   : > { %v1617_v53 = vpop.eup %1616  ;;  %v739_v54 = vadd.f32 1e-06, %v675_v49  ;;  %v723_v39 = vadd.f32 1e-06, %v659_v31  ;;  %v801_v59 = vmul.f32 %v1615_v1, %v705_v43  ;;  %v612_v21 = vmul.f32 %v2408_v50, %v2408_v50 }
 0x154   : > { %v420_v32 = vpop.xlane.xlu1 %419  ;;  %v388_v33 = vpop.xlane.xlu0 %387  ;;  %v862_v10 = vadd.f32 %v2238_v55, %v823_v40  ;;  %v878_v51 = vadd.f32 %v2238_v55, %v839_v56  ;;  %v785_v12 = vmul.f32 %v1617_v53, %v689_v57  ;;  %v596_v20 = vmul.f32 %v2410_v27, %v2410_v27 }
 0x155   : > { %1622 = vrsqrt.f32 %v739_v54  ;;  %v2412_v3 = vmul.f32 0.0078125, %v420_v32  ;;  %v2414_v13 = vmul.f32 0.0078125, %v388_v33  ;;  %v840_v15 = vmul.f32 %v2234_v44, %v801_v59 }
 0x156   : > { %1624 = vrsqrt.f32 %v723_v39  ;;  %1423 = vmatprep.mubr.f32.mxu0 %v862_v10  ;;  %1447 = vmatprep.mubr.f32.mxu1 %v878_v51  ;;  %v824_v14 = vmul.f32 %v2234_v44, %v785_v12  ;;  %v690_v47 = vsub.f32 %v2149_v5, %v2378_v11  ;;  %v707_v49 = vsub.f32 %v2154_v6, %v2380_v46 }
 0x157   : > { %v879_v0 = vadd.f32 %v2238_v55, %v840_v15  ;;  %v613_v28 = vmul.f32 %v2412_v3, %v2412_v3  ;;  %v597_v29 = vmul.f32 %v2414_v13, %v2414_v13  ;;  %v708_v32 = vsub.f32 %v2170_v16, %v2408_v50 }
 0x158   : > { %v547_v58 = vpop.xlane.xlu1 %546  ;;  %v515_v63 = vpop.xlane.xlu0 %514  ;;  %v863_v24 = vadd.f32 %v2238_v55, %v824_v14  ;;  %v692_v10 = vsub.f32 %v2173_v17, %v2410_v27  ;;  %v693_v15 = vsub.f32 %v2181_v19, %v2414_v13  ;;  %v2463_v13 = vld [vmem:[%s2592_s4] ss:$0 sm:$0xff] }
 0x159   : > { %v580_v22 = vmul.f32 0.0078125, %v547_v58  ;;  %v564_v23 = vmul.f32 0.0078125, %v515_v63  ;;  %1448 = vmatmul.mubr.f32.gmra.mxu1 %v879_v0  ;;  %v709_v58 = vsub.f32 %v2178_v18, %v2412_v3 }
 0x15a   : > { %1424 = vmatmul.mubr.f32.gmra.mxu0 %v863_v24 }
 0x15b   : > { %v644_v2 = vsub.f32 %v580_v22, %v612_v21  ;;  %v628_v37 = vsub.f32 %v564_v23, %v596_v20 }
 0x15c   : > { %v549_v45 = vpop.xlane.xlu1 %548  ;;  %v517_v26 = vpop.xlane.xlu0 %516 }
 0x15d   : > { %v676_v25 = vmax.f32 %v644_v2, 0.0  ;;  %v660_v34 = vmax.f32 %v628_v37, 0.0  ;;  %v581_v35 = vmul.f32 0.0078125, %v549_v45  ;;  %v565_v60 = vmul.f32 0.0078125, %v517_v26 }
 0x15e   : > { %v1619_v36 = vpop.eup %1618 }
 0x15f   : > { %v1621_v52 = vpop.eup %1620  ;;  %v740_v8 = vadd.f32 1e-06, %v676_v25  ;;  %v724_v38 = vadd.f32 1e-06, %v660_v34  ;;  %v645_v9 = vsub.f32 %v581_v35, %v613_v28  ;;  %v629_v41 = vsub.f32 %v565_v60, %v597_v29 }
 0x160   : > { %v786_v48 = vmul.f32 %v1621_v52, %v690_v47  ;;  %v802_v30 = vmul.f32 %v1619_v36, %v706_v61 }
 0x161   : > { %1626 = vrsqrt.f32 %v740_v8  ;;  %v677_v31 = vmax.f32 %v645_v9, 0.0  ;;  %v661_v1 = vmax.f32 %v629_v41, 0.0 }
 0x162   : > { %v1623_v40 = vpop.eup %1622  ;;  %1628 = vrsqrt.f32 %v724_v38  ;;  %v825_v5 = vmul.f32 %v2234_v44, %v786_v48  ;;  %v841_v62 = vmul.f32 %v2234_v44, %v802_v30 }
 0x163   : > { %v1625_v11 = vpop.eup %1624  ;;  %v741_v56 = vadd.f32 1e-06, %v677_v31  ;;  %v725_v53 = vadd.f32 1e-06, %v661_v1  ;;  %v803_v57 = vmul.f32 %v1623_v40, %v707_v49 }
 0x164   : > { %v864_v54 = vadd.f32 %v2238_v55, %v825_v5  ;;  %v880_v6 = vadd.f32 %v2238_v55, %v841_v62  ;;  %v787_v46 = vmul.f32 %v1625_v11, %v691_v4 }
 0x165   : > { %1630 = vrsqrt.f32 %v741_v56  ;;  %v842_v39 = vmul.f32 %v2234_v44, %v803_v57 }
 0x166   : > { %1632 = vrsqrt.f32 %v725_v53  ;;  %1426 = vmatprep.mubr.f32.mxu0 %v864_v54  ;;  %1450 = vmatprep.mubr.f32.mxu1 %v880_v6  ;;  %v826_v7 = vmul.f32 %v2234_v44, %v787_v46 }
 0x167   : > { %v881_v42 = vadd.f32 %v2238_v55, %v842_v39 }
 0x168   : > { %v865_v43 = vadd.f32 %v2238_v55, %v826_v7 }
 0x169   : > { %1451 = vmatmul.mubr.f32.gmra.mxu1 %v881_v42 }
 0x16a   : > { %1427 = vmatmul.mubr.f32.gmra.mxu0 %v865_v43 }
 0x16e   : > { %v1627_v33 = vpop.eup %1626 }
 0x16f   : > { %v1629_v51 = vpop.eup %1628  ;;  %v804_v12 = vmul.f32 %v1627_v33, %v708_v32 }
 0x170   : > { %v788_v59 = vmul.f32 %v1629_v51, %v692_v10 }
 0x171   : > { %v843_v63 = vmul.f32 %v2234_v44, %v804_v12 }
 0x172   : > { %v1631_v14 = vpop.eup %1630  ;;  %v827_v21 = vmul.f32 %v2234_v44, %v788_v59 }
 0x173   : > { %v1633_v20 = vpop.eup %1632  ;;  %v882_v16 = vadd.f32 %v2238_v55, %v843_v63  ;;  %v805_v50 = vmul.f32 %v1631_v14, %v709_v58 }
 0x174   : > { %v866_v17 = vadd.f32 %v2238_v55, %v827_v21  ;;  %v789_v27 = vmul.f32 %v1633_v20, %v693_v15 }
 0x175   : > { %1453 = vmatprep.mubr.f32.mxu1 %v882_v16  ;;  %v844_v22 = vmul.f32 %v2234_v44, %v805_v50 }
 0x176   : > { %1429 = vmatprep.mubr.f32.mxu0 %v866_v17  ;;  %v828_v18 = vmul.f32 %v2234_v44, %v789_v27 }
 0x177   : > { %v883_v3 = vadd.f32 %v2238_v55, %v844_v22 }
 0x178   : > { %v867_v19 = vadd.f32 %v2238_v55, %v828_v18 }
 0x179   : > { %1454 = vmatmul.mubr.f32.gmra.mxu1 %v883_v3 }
 0x17a   : > { %1430 = vmatmul.mubr.f32.gmra.mxu0 %v867_v19 }
 0x1c9   : > { %v1434_v24 = vpop.f32.mrf.mxu1 }
 0x1ca   : > { %v1410_v23 = vpop.f32.mrf.mxu0  ;;  %v1059_v2 = vadd.f32 %v1434_v24, %v2463_v13 }
 0x1cb   : > { %v979_v0 = vadd.f32 %v1410_v23, %v2463_v13  ;;  %v1053_v28 = vpop.f32.mrf.mxu1 }
 0x1cc   : > { %v973_v37 = vpop.f32.mrf.mxu0  ;;  %1149 = vst [vmem:[%s2469_s11 + $0x88] sm:$0xff] %v1059_v2  ;;  %v1054_v55 = vadd.f32 %v2463_v13, %v1053_v28 }
 0x1cd   : > { %1133 = vst [vmem:[%s2469_s11 + $0x8] sm:$0xff] %v979_v0  ;;  %v974_v44 = vadd.f32 %v2463_v13, %v973_v37 }
 0x1ce   : > { %1148 = vst [vmem:[%s2469_s11 + $0x80] sm:$0xff] %v1054_v55 }
 0x1cf   : > { %1132 = vst [vmem:[%s2469_s11] sm:$0xff] %v974_v44 }
 0x1d9   : > { %v1437_v45 = vpop.f32.mrf.mxu1 }
 0x1da   : > { %v1413_v29 = vpop.f32.mrf.mxu0  ;;  %v1069_v25 = vadd.f32 %v1437_v45, %v2463_v13 }
 0x1db   : > { %v989_v26 = vadd.f32 %v1413_v29, %v2463_v13  ;;  %v1063_v35 = vpop.f32.mrf.mxu1 }
 0x1dc   : > { %v983_v34 = vpop.f32.mrf.mxu0  ;;  %1151 = vst [vmem:[%s2469_s11 + $0x98] sm:$0xff] %v1069_v25  ;;  %v1064_v36 = vadd.f32 %v2463_v13, %v1063_v35 }
 0x1dd   : > { %1135 = vst [vmem:[%s2469_s11 + $0x18] sm:$0xff] %v989_v26  ;;  %v984_v60 = vadd.f32 %v2463_v13, %v983_v34 }
 0x1de   : > { %1150 = vst [vmem:[%s2469_s11 + $0x90] sm:$0xff] %v1064_v36 }
 0x1df   : > { %1134 = vst [vmem:[%s2469_s11 + $0x10] sm:$0xff] %v984_v60 }
 0x1e9   : > { %v1440_v47 = vpop.f32.mrf.mxu1 }
 0x1ea   : > { %v1416_v61 = vpop.f32.mrf.mxu0  ;;  %v1079_v8 = vadd.f32 %v1440_v47, %v2463_v13 }
 0x1eb   : > { %v999_v52 = vadd.f32 %v1416_v61, %v2463_v13  ;;  %v1073_v9 = vpop.f32.mrf.mxu1 }
 0x1ec   : > { %v993_v38 = vpop.f32.mrf.mxu0  ;;  %1153 = vst [vmem:[%s2469_s11 + $0xa8] sm:$0xff] %v1079_v8  ;;  %v1074_v48 = vadd.f32 %v2463_v13, %v1073_v9 }
 0x1ed   : > { %1137 = vst [vmem:[%s2469_s11 + $0x28] sm:$0xff] %v999_v52  ;;  %v994_v41 = vadd.f32 %v2463_v13, %v993_v38 }
 0x1ee   : > { %1152 = vst [vmem:[%s2469_s11 + $0xa0] sm:$0xff] %v1074_v48 }
 0x1ef   : > { %1136 = vst [vmem:[%s2469_s11 + $0x20] sm:$0xff] %v994_v41 }
 0x1f9   : > { %v1443_v49 = vpop.f32.mrf.mxu1 }
 0x1fa   : > { %v1419_v30 = vpop.f32.mrf.mxu0  ;;  %v1089_v1 = vadd.f32 %v1443_v49, %v2463_v13 }
 0x1fb   : > { %v1009_v31 = vadd.f32 %v1419_v30, %v2463_v13  ;;  %v1083_v4 = vpop.f32.mrf.mxu1 }
 0x1fc   : > { %v1003_v40 = vpop.f32.mrf.mxu0  ;;  %1155 = vst [vmem:[%s2469_s11 + $0xb8] sm:$0xff] %v1089_v1  ;;  %v1084_v62 = vadd.f32 %v2463_v13, %v1083_v4 }
 0x1fd   : > { %1139 = vst [vmem:[%s2469_s11 + $0x38] sm:$0xff] %v1009_v31  ;;  %v1004_v5 = vadd.f32 %v2463_v13, %v1003_v40 }
 0x1fe   : > { %1154 = vst [vmem:[%s2469_s11 + $0xb0] sm:$0xff] %v1084_v62 }
 0x1ff   : > { %1138 = vst [vmem:[%s2469_s11 + $0x30] sm:$0xff] %v1004_v5 }
 0x209   : > { %v1446_v56 = vpop.f32.mrf.mxu1 }
 0x20a   : > { %v1422_v11 = vpop.f32.mrf.mxu0  ;;  %v1099_v57 = vadd.f32 %v1446_v56, %v2463_v13 }
 0x20b   : > { %v1019_v53 = vadd.f32 %v1422_v11, %v2463_v13  ;;  %v1093_v6 = vpop.f32.mrf.mxu1 }
 0x20c   : > { %v1013_v54 = vpop.f32.mrf.mxu0  ;;  %1157 = vst [vmem:[%s2469_s11 + $0xc8] sm:$0xff] %v1099_v57  ;;  %v1094_v39 = vadd.f32 %v2463_v13, %v1093_v6 }
 0x20d   : > { %1141 = vst [vmem:[%s2469_s11 + $0x48] sm:$0xff] %v1019_v53  ;;  %v1014_v46 = vadd.f32 %v2463_v13, %v1013_v54 }
 0x20e   : > { %1156 = vst [vmem:[%s2469_s11 + $0xc0] sm:$0xff] %v1094_v39 }
 0x20f   : > { %1140 = vst [vmem:[%s2469_s11 + $0x40] sm:$0xff] %v1014_v46 }
 0x219   : > { %v1449_v42 = vpop.f32.mrf.mxu1 }
 0x21a   : > { %v1425_v7 = vpop.f32.mrf.mxu0  ;;  %v1109_v32 = vadd.f32 %v1449_v42, %v2463_v13 }
 0x21b   : > { %v1029_v43 = vadd.f32 %v1425_v7, %v2463_v13  ;;  %v1103_v10 = vpop.f32.mrf.mxu1 }
 0x21c   : > { %v1023_v33 = vpop.f32.mrf.mxu0  ;;  %1159 = vst [vmem:[%s2469_s11 + $0xd8] sm:$0xff] %v1109_v32  ;;  %v1104_v12 = vadd.f32 %v2463_v13, %v1103_v10 }
 0x21d   : > { %1143 = vst [vmem:[%s2469_s11 + $0x58] sm:$0xff] %v1029_v43  ;;  %v1024_v51 = vadd.f32 %v2463_v13, %v1023_v33 }
 0x21e   : > { %1158 = vst [vmem:[%s2469_s11 + $0xd0] sm:$0xff] %v1104_v12 }
 0x21f   : > { %1142 = vst [vmem:[%s2469_s11 + $0x50] sm:$0xff] %v1024_v51 }
 0x229   : > { %v1452_v59 = vpop.f32.mrf.mxu1 }
 0x22a   : > { %v1428_v58 = vpop.f32.mrf.mxu0  ;;  %v1119_v63 = vadd.f32 %v1452_v59, %v2463_v13 }
 0x22b   : > { %v1039_v14 = vadd.f32 %v1428_v58, %v2463_v13  ;;  %v1113_v15 = vpop.f32.mrf.mxu1 }
 0x22c   : > { %1161 = vst [vmem:[%s2469_s11 + $0xe8] sm:$0xff] %v1119_v63  ;;  %v1033_v21 = vpop.f32.mrf.mxu0  ;;  %v1114_v20 = vadd.f32 %v2463_v13, %v1113_v15 }
 0x22d   : > { %1145 = vst [vmem:[%s2469_s11 + $0x68] sm:$0xff] %v1039_v14  ;;  %v1034_v16 = vadd.f32 %v2463_v13, %v1033_v21 }
 0x22e   : > { %1160 = vst [vmem:[%s2469_s11 + $0xe0] sm:$0xff] %v1114_v20 }
 0x22f   : > { %1144 = vst [vmem:[%s2469_s11 + $0x60] sm:$0xff] %v1034_v16 }
 0x239   : > { %v1455_v50 = vpop.f32.mrf.mxu1 }
 0x23a   : > { %v1431_v17 = vpop.f32.mrf.mxu0  ;;  %v1129_v27 = vadd.f32 %v1455_v50, %v2463_v13 }
 0x23b   : > { %v1049_v22 = vadd.f32 %v1431_v17, %v2463_v13  ;;  %v1123_v18 = vpop.f32.mrf.mxu1 }
 0x23c   : > { %1163 = vst [vmem:[%s2469_s11 + $0xf8] sm:$0xff] %v1129_v27  ;;  %v1043_v3 = vpop.f32.mrf.mxu0  ;;  %v1124_v19 = vadd.f32 %v2463_v13, %v1123_v18 }
 0x23d   : > { %1147 = vst [vmem:[%s2469_s11 + $0x78] sm:$0xff] %v1049_v22  ;;  %v1044_v23 = vadd.f32 %v2463_v13, %v1043_v3 }
 0x23e   : > { %1162 = vst [vmem:[%s2469_s11 + $0xf0] sm:$0xff] %v1124_v19 }
 0x23f   : > { %1146 = vst [vmem:[%s2469_s11 + $0x70] sm:$0xff] %v1044_v23 }
 0x240   : > { %1729 = shalt.err (!%p1726_p9)
}
 0x241   : > { %s1730_s20 = scalar_lea.hbm %s2534_s25, 4096  ;;  %s1734_s28 = scalar_lea.hbm %s2593_s5, 8192 }
 0x242   : > { %p1731_p12 = scmp.ne.s32.totalorder %s2534_s25, %s1730_s20  ;;  %p1735_p3 = scmp.lt.s32.totalorder %s2534_s25, %s2593_s5 }
 0x243   : > { %p1736_p1 = scmp.lt.s32.totalorder %s1734_s28, %s1730_s20 }
 0x244   : > { %p1732_p13 = pnand %p1731_p12, %p1930_p0 }
 0x245   : > { %p1737_p4 = por %p1736_p1, %p1735_p3 }
 0x246   : > { %p1733_p11 = pneg %p1732_p13 }
 0x248   : > { %p1738_p8 = pnand %p1737_p4, %p1733_p11 }
 0x24a   : > { %1741 = shalt.err (!%p1738_p8)
}
 0x24b   : > { %s1812_s26 = smov 128   ;;  %s1813_s9 = smov 8  }
 0x24c   : > { %1496 = dma.vmem_to_hbm [thread:$0]  (%p1930_p0), %s2536_s6, 4096, %s2534_s25, %s1165_s21, %s1812_s26, %s1812_s26, %s1813_s9  }
 0x24d PF: > { %s2620_s10 = sld [smem:[#allocation15_spill]]  ;;  %s1195_s29 = sand.u32 1, %s1784_s18  }
 0x24e   : > { %s2621_s17 = sld [smem:[#allocation14_spill]]  ;;  %s1196_s11 = scalar_lea.sflag [#allocation4], %s1195_s29 }
 0x253   : > { %p2622_p5 = scmp.ne.s32.totalorder %s2620_s10, 0 }
 0x255   : > { %p1510_p7 = pnand %p1309_p10, %p2622_p5 }
 0x257   : > { %p1511_p2 = pneg %p1510_p7 }
 0x259   : > { %1779 = dma.done.wait (%p1511_p2), %s1196_s11, 4096  }
 0x25a   : > { %1781 = vsyncadd (%p1511_p2), %s1196_s11, 4294963200  ;;  %s24_s23 = sadd.s32 1, %s2621_s17   ;;  %s2623_s16 = sld [smem:[#allocation13_spill]] }
 0x25b   : > { %p21_p6 = scmp.ge.s32.totalorder %s24_s23, 4   ;;  %s2624_s20 = sld [smem:[#allocation17_spill]] }
 0x25c   : > { %s2625_s15 = sld [smem:[#allocation16_spill]]  ;;  %s2626_s18 = smov %s1788_s19 }
 0x25d   : > { %s2628_s21 = smov %s1800_s22 }
 0x25e   :  { %23 = sbr.rel (!%p21_p6) target bundleno = 11 (0xb), region = 105 }
 0x260   : > { %s2627_s19 = smov %s2623_s16 }
 0x262   : > { %s2629_s22 = smov %s2625_s15 }
 0x263   :  { %1201 = vsyncpa [#allocation3], 1 }
 0x264   :  { %1203 = vsyncpa [#allocation3 + $0x1], 1 }
 0x265   :  { %1204 = vsyncpa [#allocation6], 1 }
 0x266   :  { %1206 = vsyncpa [#allocation6 + $0x1], 1 }
 0x267   :  { %1207 = vsyncpa [#allocation4], 1 }
 0x268   :  { %1209 = vsyncpa [#allocation4 + $0x1], 1 }

</bundles_post_ra>
